<compile_context>
chip_gen: v6e
topology: v6e:2x2x1
jax: 0.10.0
libtpu: 0.0.40
codegen_flags: <defaults>
</compile_context>

<pallas_src>
import math

import jax
import jax.numpy as jnp
from jax.experimental import pallas as pl
from jax.experimental.pallas import tpu as pltpu


# ----------------------------------------------------------------------------
# Configuration (small synthetic DistilBERT + the module's MLP head)
# ----------------------------------------------------------------------------
VOCAB_SIZE = 128
MAX_POS = 64
DIM = 64            # bert_hidden_size (synthetic, real DistilBERT = 768)
N_HEADS = 4
HEAD_DIM = DIM // N_HEADS
FFN_DIM = 128
N_LAYERS = 2        # synthetic (real DistilBERT = 6)
LN_EPS = 1e-12

HIDDEN1 = 256       # module: hidden_size
HIDDEN2 = 32        # module: hidden_size2
OUT_DIM = 1         # module: output_dim
OUT_PAD = 128       # lane-dense padded head output width

BATCH = 2
SEQ = 8

MASK_NEG = -1e30    # additive mask bias for padded keys


def _gelu(x):
    # TODO(synk): torch nn.GELU / HF DistilBERT use erf-exact GELU; tanh approximation used here.
    return jax.nn.gelu(x, approximate=True)


# ----------------------------------------------------------------------------
# Fused whole-model Pallas kernel (one batch element per grid step)
# ----------------------------------------------------------------------------
def _model_kernel(emb_ref, maskb_ref,
                  embg_ref, embb_ref,
                  qkvw_ref, qkvb_ref, ow_ref, ob_ref,
                  ln1g_ref, ln1b_ref,
                  f1w_ref, f1b_ref, f2w_ref, f2b_ref,
                  ln2g_ref, ln2b_ref,
                  h1w_ref, h1b_ref, h2w_ref, h2b_ref, cw_ref, cb_ref,
                  out_ref):
    """Embedding LN + N_LAYERS transformer blocks + classification head.

    Activations are kept as f32 values with DIM on the lane axis; matmul
    operands are cast to bf16 for the MXU, LN/softmax/GELU run in f32.
    """
    x = emb_ref[0]                      # (S, DIM) f32, word+pos already summed
    mask_bias = maskb_ref[0]            # (1, S) f32 additive bias (0 / -1e30)

    def ln(v, g, b):
        v = v.astype(jnp.float32)
        mu = jnp.mean(v, axis=-1, keepdims=True)
        var = jnp.mean((v - mu) * (v - mu), axis=-1, keepdims=True)
        return (v - mu) * jax.lax.rsqrt(var + LN_EPS) * g + b

    def mm(a, w):                       # f32 activations x bf16 weights -> f32
        return jnp.dot(a.astype(jnp.bfloat16), w,
                       preferred_element_type=jnp.float32)

    h = ln(x, embg_ref[...], embb_ref[...])                     # (S, DIM)

    scale = 1.0 / math.sqrt(HEAD_DIM)
    for l in range(N_LAYERS):
        # ---- multi-head self-attention (fused QKV projection) ----
        qkv = mm(h, qkvw_ref[l]) + qkvb_ref[l]                  # (S, 3*DIM)
        q = qkv[:, 0:DIM]
        k = qkv[:, DIM:2 * DIM]
        v = qkv[:, 2 * DIM:3 * DIM]

        ctx_parts = []
        for hd in range(N_HEADS):
            lo = hd * HEAD_DIM
            qh = q[:, lo:lo + HEAD_DIM].astype(jnp.bfloat16)    # (S, Dh)
            kh = k[:, lo:lo + HEAD_DIM].astype(jnp.bfloat16)
            vh = v[:, lo:lo + HEAD_DIM].astype(jnp.bfloat16)
            s = jax.lax.dot_general(                             # q @ k^T -> (S, S)
                qh, kh,
                dimension_numbers=(((1,), (1,)), ((), ())),
                preferred_element_type=jnp.float32) * scale
            s = s + mask_bias                                    # key padding mask
            s = s - jnp.max(s, axis=-1, keepdims=True)
            p = jnp.exp(s)
            p = p * pl.reciprocal(jnp.sum(p, axis=-1, keepdims=True), approx=True)
            ctx_parts.append(jnp.dot(p.astype(jnp.bfloat16), vh,
                                     preferred_element_type=jnp.float32))
        ctx = jnp.concatenate(ctx_parts, axis=-1)                # (S, DIM)

        sa = mm(ctx, ow_ref[l]) + ob_ref[l]
        h = ln(sa + h, ln1g_ref[l], ln1b_ref[l])

        # ---- feed-forward ----
        ffn = _gelu(mm(h, f1w_ref[l]) + f1b_ref[l])
        ffn = mm(ffn, f2w_ref[l]) + f2b_ref[l]
        h = ln(ffn + h, ln2g_ref[l], ln2b_ref[l])

    # ---- classification head on the [CLS] (position 0) token ----
    cls = h[0:1, :]                                              # (1, DIM)
    hh = _gelu(mm(cls, h1w_ref[...]) + h1b_ref[...])             # dropout = identity
    hh = _gelu(mm(hh, h2w_ref[...]) + h2b_ref[...])              # dropout = identity
    logits = mm(hh, cw_ref[...]) + cb_ref[...]                   # (1, OUT_PAD)
    out_ref[0] = jax.nn.sigmoid(logits).astype(out_ref.dtype)


def fused_forward(emb, mask_bias, p):
    """emb: (B, S, DIM) f32; mask_bias: (B, 1, S) f32; p: packed parameter dict."""
    B = emb.shape[0]

    def weight_spec(arr):
        shp = arr.shape
        return pl.BlockSpec(shp, lambda b, _n=len(shp): (0,) * _n)

    weights = [
        p["emb_ln_g"], p["emb_ln_b"],
        p["qkv_w"], p["qkv_b"], p["o_w"], p["o_b"],
        p["ln1_g"], p["ln1_b"],
        p["f1_w"], p["f1_b"], p["f2_w"], p["f2_b"],
        p["ln2_g"], p["ln2_b"],
        p["h1_w"], p["h1_b"], p["h2_w"], p["h2_b"], p["c_w"], p["c_b"],
    ]

    in_specs = [
        pl.BlockSpec((1, SEQ, DIM), lambda b: (b, 0, 0)),
        pl.BlockSpec((1, 1, SEQ), lambda b: (b, 0, 0)),
    ] + [weight_spec(w) for w in weights]

    return pl.pallas_call(
        _model_kernel,
        out_shape=jax.ShapeDtypeStruct((B, 1, OUT_PAD), jnp.float32),
        grid=(B,),
        in_specs=in_specs,
        out_specs=pl.BlockSpec((1, 1, OUT_PAD), lambda b: (b, 0, 0)),
        compiler_params=pltpu.CompilerParams(
            dimension_semantics=("parallel",)),
    )(emb, mask_bias, *weights)


# ----------------------------------------------------------------------------
# Parameter initialization (deterministic, synthetic) + packing for the kernel
# ----------------------------------------------------------------------------
def init_params(key):
    def dense(k, fan_in, fan_out):
        w = 0.02 * jax.random.normal(k, (fan_in, fan_out), jnp.float32)
        b = jnp.zeros((fan_out,), jnp.float32)
        return w, b

    keys = jax.random.split(key, 8 + 8 * N_LAYERS)
    ki = iter(keys)

    word_emb = 0.02 * jax.random.normal(next(ki), (VOCAB_SIZE, DIM), jnp.float32)
    pos_emb = 0.02 * jax.random.normal(next(ki), (MAX_POS, DIM), jnp.float32)

    qkv_w, qkv_b, o_w, o_b = [], [], [], []
    ln1_g, ln1_b, ln2_g, ln2_b = [], [], [], []
    f1_w, f1_b, f2_w, f2_b = [], [], [], []
    for _ in range(N_LAYERS):
        qw, qb = dense(next(ki), DIM, DIM)
        kw, kb = dense(next(ki), DIM, DIM)
        vw, vb = dense(next(ki), DIM, DIM)
        ow_, ob_ = dense(next(ki), DIM, DIM)
        w1, b1 = dense(next(ki), DIM, FFN_DIM)
        w2, b2 = dense(next(ki), FFN_DIM, DIM)
        qkv_w.append(jnp.concatenate([qw, kw, vw], axis=1))       # (DIM, 3*DIM)
        qkv_b.append(jnp.concatenate([qb, kb, vb])[None, :])      # (1, 3*DIM)
        o_w.append(ow_)
        o_b.append(ob_[None, :])
        ln1_g.append(jnp.ones((1, DIM), jnp.float32))
        ln1_b.append(jnp.zeros((1, DIM), jnp.float32))
        f1_w.append(w1)
        f1_b.append(b1[None, :])
        f2_w.append(w2)
        f2_b.append(b2[None, :])
        ln2_g.append(jnp.ones((1, DIM), jnp.float32))
        ln2_b.append(jnp.zeros((1, DIM), jnp.float32))

    h1_w, h1_b = dense(next(ki), DIM, HIDDEN1)
    h2_w, h2_b = dense(next(ki), HIDDEN1, HIDDEN2)
    c_w, c_b = dense(next(ki), HIDDEN2, OUT_DIM)
    # Pad the 1-wide classifier to 128 lanes (lane-dense output store).
    c_w_pad = jnp.zeros((HIDDEN2, OUT_PAD), jnp.float32).at[:, :OUT_DIM].set(c_w)
    c_b_pad = jnp.zeros((1, OUT_PAD), jnp.float32).at[:, :OUT_DIM].set(c_b[None, :])

    bf16 = jnp.bfloat16
    packed = {
        "word_emb": word_emb,
        "pos_emb": pos_emb,
        "emb_ln_g": jnp.ones((1, DIM), jnp.float32),
        "emb_ln_b": jnp.zeros((1, DIM), jnp.float32),
        "qkv_w": jnp.stack(qkv_w).astype(bf16),   # (L, DIM, 3*DIM)
        "qkv_b": jnp.stack(qkv_b),                # (L, 1, 3*DIM) f32
        "o_w": jnp.stack(o_w).astype(bf16),       # (L, DIM, DIM)
        "o_b": jnp.stack(o_b),
        "ln1_g": jnp.stack(ln1_g), "ln1_b": jnp.stack(ln1_b),
        "f1_w": jnp.stack(f1_w).astype(bf16), "f1_b": jnp.stack(f1_b),
        "f2_w": jnp.stack(f2_w).astype(bf16), "f2_b": jnp.stack(f2_b),
        "ln2_g": jnp.stack(ln2_g), "ln2_b": jnp.stack(ln2_b),
        "h1_w": h1_w.astype(bf16), "h1_b": h1_b[None, :],
        "h2_w": h2_w.astype(bf16), "h2_b": h2_b[None, :],
        "c_w": c_w_pad.astype(bf16), "c_b": c_b_pad,
    }
    return packed


# ----------------------------------------------------------------------------
# Forward pass (mirrors BertClassificationML.forward, eval mode)
# ----------------------------------------------------------------------------
@jax.jit
def bert_classification_ml_forward(params, input_ids, attention_mask):
    B, S = input_ids.shape

    # DistilBERT embeddings: word + position (gather is JAX glue, LN is in-kernel).
    word = jnp.take(params["word_emb"], input_ids, axis=0)        # (B, S, D)
    pos = params["pos_emb"][:S][None, :, :]                       # (1, S, D)
    emb = (word + pos).astype(jnp.float32)                        # (B, S, D)

    # Additive key-padding bias, computed once and reused across all layers.
    mask_bias = ((1.0 - attention_mask.astype(jnp.float32)) * MASK_NEG).reshape(B, 1, S)

    out = fused_forward(emb, mask_bias, params)                   # (B, 1, OUT_PAD)
    # cls_token = bert_output[0][:, 0]; head output flattened -> (B,)
    return out[:, 0, 0]


# ----------------------------------------------------------------------------
# Driver
# ----------------------------------------------------------------------------
if __name__ == "__main__":
    key = jax.random.PRNGKey(0)
    k_param, k_ids, k_mask = jax.random.split(key, 3)

    params = init_params(k_param)

    input_ids = jax.random.randint(k_ids, (BATCH, SEQ), 0, VOCAB_SIZE, dtype=jnp.int32)
    # valid tokens = 1, padding = 0 (pad the last two positions of example 1)
    attention_mask = jnp.ones((BATCH, SEQ), dtype=jnp.int32)
    attention_mask = attention_mask.at[1, SEQ - 2:].set(0)

    out = bert_classification_ml_forward(params, input_ids, attention_mask)
    out = jax.block_until_ready(out)

    assert out.shape == (BATCH,)
    assert bool(jnp.all(jnp.isfinite(out)))
    assert bool(jnp.all((out >= 0.0) & (out <= 1.0)))
    print("KERNEL_OK")
</pallas_src>

<mosaic_0001>
module attributes {stable_mosaic.version = 11 : i64} {
  func.func @_model_kernel(%arg0: i32, %arg1: memref<1x8x64xf32, #tpu.memory_space<vmem>>, %arg2: memref<1x1x8xf32, #tpu.memory_space<vmem>>, %arg3: memref<1x64xf32, #tpu.memory_space<vmem>>, %arg4: memref<1x64xf32, #tpu.memory_space<vmem>>, %arg5: memref<2x64x192xbf16, #tpu.memory_space<vmem>>, %arg6: memref<2x1x192xf32, #tpu.memory_space<vmem>>, %arg7: memref<2x64x64xbf16, #tpu.memory_space<vmem>>, %arg8: memref<2x1x64xf32, #tpu.memory_space<vmem>>, %arg9: memref<2x1x64xf32, #tpu.memory_space<vmem>>, %arg10: memref<2x1x64xf32, #tpu.memory_space<vmem>>, %arg11: memref<2x64x128xbf16, #tpu.memory_space<vmem>>, %arg12: memref<2x1x128xf32, #tpu.memory_space<vmem>>, %arg13: memref<2x128x64xbf16, #tpu.memory_space<vmem>>, %arg14: memref<2x1x64xf32, #tpu.memory_space<vmem>>, %arg15: memref<2x1x64xf32, #tpu.memory_space<vmem>>, %arg16: memref<2x1x64xf32, #tpu.memory_space<vmem>>, %arg17: memref<64x256xbf16, #tpu.memory_space<vmem>>, %arg18: memref<1x256xf32, #tpu.memory_space<vmem>>, %arg19: memref<256x32xbf16, #tpu.memory_space<vmem>>, %arg20: memref<1x32xf32, #tpu.memory_space<vmem>>, %arg21: memref<32x128xbf16, #tpu.memory_space<vmem>>, %arg22: memref<1x128xf32, #tpu.memory_space<vmem>>, %arg23: memref<1x1x128xf32, #tpu.memory_space<vmem>>) attributes {dimension_semantics = [#tpu.dimension_semantics<parallel>], iteration_bounds = array<i64: 2>, scalar_prefetch = 0 : i64, scratch_operands = 0 : i64, tpu.core_type = #tpu.core_type<tc>, window_params = [{transform_indices = @transform_0, window_bounds = array<i64: 1, 8, 64>}, {transform_indices = @transform_1, window_bounds = array<i64: 1, 1, 8>}, {pipeline_mode = #tpu.pipeline_mode<synchronous>, transform_indices = @transform_2, window_bounds = array<i64: 1, 64>}, {pipeline_mode = #tpu.pipeline_mode<synchronous>, transform_indices = @transform_3, window_bounds = array<i64: 1, 64>}, {pipeline_mode = #tpu.pipeline_mode<synchronous>, transform_indices = @transform_4, window_bounds = array<i64: 2, 64, 192>}, {pipeline_mode = #tpu.pipeline_mode<synchronous>, transform_indices = @transform_5, window_bounds = array<i64: 2, 1, 192>}, {pipeline_mode = #tpu.pipeline_mode<synchronous>, transform_indices = @transform_6, window_bounds = array<i64: 2, 64, 64>}, {pipeline_mode = #tpu.pipeline_mode<synchronous>, transform_indices = @transform_7, window_bounds = array<i64: 2, 1, 64>}, {pipeline_mode = #tpu.pipeline_mode<synchronous>, transform_indices = @transform_8, window_bounds = array<i64: 2, 1, 64>}, {pipeline_mode = #tpu.pipeline_mode<synchronous>, transform_indices = @transform_9, window_bounds = array<i64: 2, 1, 64>}, {pipeline_mode = #tpu.pipeline_mode<synchronous>, transform_indices = @transform_10, window_bounds = array<i64: 2, 64, 128>}, {pipeline_mode = #tpu.pipeline_mode<synchronous>, transform_indices = @transform_11, window_bounds = array<i64: 2, 1, 128>}, {pipeline_mode = #tpu.pipeline_mode<synchronous>, transform_indices = @transform_12, window_bounds = array<i64: 2, 128, 64>}, {pipeline_mode = #tpu.pipeline_mode<synchronous>, transform_indices = @transform_13, window_bounds = array<i64: 2, 1, 64>}, {pipeline_mode = #tpu.pipeline_mode<synchronous>, transform_indices = @transform_14, window_bounds = array<i64: 2, 1, 64>}, {pipeline_mode = #tpu.pipeline_mode<synchronous>, transform_indices = @transform_15, window_bounds = array<i64: 2, 1, 64>}, {pipeline_mode = #tpu.pipeline_mode<synchronous>, transform_indices = @transform_16, window_bounds = array<i64: 64, 256>}, {pipeline_mode = #tpu.pipeline_mode<synchronous>, transform_indices = @transform_17, window_bounds = array<i64: 1, 256>}, {pipeline_mode = #tpu.pipeline_mode<synchronous>, transform_indices = @transform_18, window_bounds = array<i64: 256, 32>}, {pipeline_mode = #tpu.pipeline_mode<synchronous>, transform_indices = @transform_19, window_bounds = array<i64: 1, 32>}, {pipeline_mode = #tpu.pipeline_mode<synchronous>, transform_indices = @transform_20, window_bounds = array<i64: 32, 128>}, {pipeline_mode = #tpu.pipeline_mode<synchronous>, transform_indices = @transform_21, window_bounds = array<i64: 1, 128>}, {transform_indices = @transform_22, window_bounds = array<i64: 1, 1, 128>}]} {
    %c0 = arith.constant 0 : index
    %c0_0 = arith.constant 0 : index
    %c0_1 = arith.constant 0 : index
    %0 = vector.load %arg1[%c0, %c0_0, %c0_1] : memref<1x8x64xf32, #tpu.memory_space<vmem>>, vector<1x8x64xf32>
    %1 = vector.shape_cast %0 : vector<1x8x64xf32> to vector<8x64xf32>
    %c0_2 = arith.constant 0 : index
    %c0_3 = arith.constant 0 : index
    %c0_4 = arith.constant 0 : index
    %2 = vector.load %arg2[%c0_2, %c0_3, %c0_4] : memref<1x1x8xf32, #tpu.memory_space<vmem>>, vector<1x1x8xf32>
    %3 = vector.shape_cast %2 : vector<1x1x8xf32> to vector<1x8xf32>
    %c0_5 = arith.constant 0 : index
    %c0_6 = arith.constant 0 : index
    %4 = vector.load %arg3[%c0_5, %c0_6] : memref<1x64xf32, #tpu.memory_space<vmem>>, vector<1x64xf32>
    %c0_7 = arith.constant 0 : index
    %c0_8 = arith.constant 0 : index
    %5 = vector.load %arg4[%c0_7, %c0_8] : memref<1x64xf32, #tpu.memory_space<vmem>>, vector<1x64xf32>
    %cst = arith.constant dense<0.000000e+00> : vector<8xf32>
    %6 = vector.multi_reduction <add>, %1, %cst [1] : vector<8x64xf32> to vector<8xf32>
    %7 = vector.shape_cast %6 : vector<8xf32> to vector<8x1xf32>
    %cst_9 = arith.constant 6.400000e+01 : f32
    %8 = vector.broadcast %cst_9 : f32 to vector<8x1xf32>
    %9 = arith.divf %7, %8 : vector<8x1xf32>
    %10 = vector.broadcast %9 : vector<8x1xf32> to vector<8x64xf32>
    %11 = arith.subf %1, %10 : vector<8x64xf32>
    %12 = vector.broadcast %9 : vector<8x1xf32> to vector<8x64xf32>
    %13 = arith.subf %1, %12 : vector<8x64xf32>
    %14 = arith.mulf %11, %13 : vector<8x64xf32>
    %cst_10 = arith.constant dense<0.000000e+00> : vector<8xf32>
    %15 = vector.multi_reduction <add>, %14, %cst_10 [1] : vector<8x64xf32> to vector<8xf32>
    %16 = vector.shape_cast %15 : vector<8xf32> to vector<8x1xf32>
    %cst_11 = arith.constant 6.400000e+01 : f32
    %17 = vector.broadcast %cst_11 : f32 to vector<8x1xf32>
    %18 = arith.divf %16, %17 : vector<8x1xf32>
    %19 = vector.broadcast %9 : vector<8x1xf32> to vector<8x64xf32>
    %20 = arith.subf %1, %19 : vector<8x64xf32>
    %cst_12 = arith.constant 9.99999996E-13 : f32
    %21 = vector.broadcast %cst_12 : f32 to vector<8x1xf32>
    %22 = arith.addf %18, %21 : vector<8x1xf32>
    %23 = math.rsqrt %22 : vector<8x1xf32>
    %24 = vector.broadcast %23 : vector<8x1xf32> to vector<8x64xf32>
    %25 = arith.mulf %20, %24 : vector<8x64xf32>
    %26 = vector.broadcast %4 : vector<1x64xf32> to vector<8x64xf32>
    %27 = arith.mulf %25, %26 : vector<8x64xf32>
    %28 = vector.broadcast %5 : vector<1x64xf32> to vector<8x64xf32>
    %29 = arith.addf %27, %28 : vector<8x64xf32>
    %c0_13 = arith.constant 0 : index
    %c0_14 = arith.constant 0 : index
    %c0_15 = arith.constant 0 : index
    %30 = vector.load %arg5[%c0_13, %c0_14, %c0_15] : memref<2x64x192xbf16, #tpu.memory_space<vmem>>, vector<1x64x192xbf16>
    %31 = vector.shape_cast %30 : vector<1x64x192xbf16> to vector<64x192xbf16>
    %32 = arith.truncf %29 : vector<8x64xf32> to vector<8x64xbf16>
    %cst_16 = arith.constant dense<0.000000e+00> : vector<8x192xf32>
    %33 = tpu.matmul %32, %31, %cst_16 {dimension_numbers = #tpu.dot_dimension_numbers<[1], [0], [0], [1], [0, 0, 1, 1], [], []>} : vector<8x64xbf16>, vector<64x192xbf16>, vector<8x192xf32> -> vector<8x192xf32>
    %c0_17 = arith.constant 0 : index
    %c0_18 = arith.constant 0 : index
    %c0_19 = arith.constant 0 : index
    %34 = vector.load %arg6[%c0_17, %c0_18, %c0_19] : memref<2x1x192xf32, #tpu.memory_space<vmem>>, vector<1x1x192xf32>
    %35 = vector.shape_cast %34 : vector<1x1x192xf32> to vector<1x192xf32>
    %36 = vector.broadcast %35 : vector<1x192xf32> to vector<8x192xf32>
    %37 = arith.addf %33, %36 : vector<8x192xf32>
    %38 = vector.extract_strided_slice %37 {offsets = [0, 0], sizes = [8, 64], strides = [1, 1]} : vector<8x192xf32> to vector<8x64xf32>
    %39 = vector.extract_strided_slice %37 {offsets = [0, 64], sizes = [8, 64], strides = [1, 1]} : vector<8x192xf32> to vector<8x64xf32>
    %40 = vector.extract_strided_slice %37 {offsets = [0, 128], sizes = [8, 64], strides = [1, 1]} : vector<8x192xf32> to vector<8x64xf32>
    %41 = vector.extract_strided_slice %38 {offsets = [0, 0], sizes = [8, 16], strides = [1, 1]} : vector<8x64xf32> to vector<8x16xf32>
    %42 = arith.truncf %41 : vector<8x16xf32> to vector<8x16xbf16>
    %43 = vector.extract_strided_slice %39 {offsets = [0, 0], sizes = [8, 16], strides = [1, 1]} : vector<8x64xf32> to vector<8x16xf32>
    %44 = arith.truncf %43 : vector<8x16xf32> to vector<8x16xbf16>
    %45 = vector.extract_strided_slice %40 {offsets = [0, 0], sizes = [8, 16], strides = [1, 1]} : vector<8x64xf32> to vector<8x16xf32>
    %46 = arith.truncf %45 : vector<8x16xf32> to vector<8x16xbf16>
    %cst_20 = arith.constant dense<0.000000e+00> : vector<8x8xf32>
    %47 = tpu.matmul %42, %44, %cst_20 {dimension_numbers = #tpu.dot_dimension_numbers<[1], [1], [0], [0], [0, 0, 1, 0], [], []>} : vector<8x16xbf16>, vector<8x16xbf16>, vector<8x8xf32> -> vector<8x8xf32>
    %cst_21 = arith.constant 2.500000e-01 : f32
    %48 = vector.broadcast %cst_21 : f32 to vector<8x8xf32>
    %49 = arith.mulf %47, %48 : vector<8x8xf32>
    %50 = vector.broadcast %3 : vector<1x8xf32> to vector<8x8xf32>
    %51 = arith.addf %49, %50 : vector<8x8xf32>
    %cst_22 = arith.constant dense<0xFF800000> : vector<8xf32>
    %52 = vector.multi_reduction <maximumf>, %51, %cst_22 [1] : vector<8x8xf32> to vector<8xf32>
    %53 = vector.shape_cast %52 : vector<8xf32> to vector<8x1xf32>
    %54 = vector.broadcast %53 : vector<8x1xf32> to vector<8x8xf32>
    %55 = arith.subf %51, %54 : vector<8x8xf32>
    %56 = math.exp %55 : vector<8x8xf32>
    %cst_23 = arith.constant dense<0.000000e+00> : vector<8xf32>
    %57 = vector.multi_reduction <add>, %56, %cst_23 [1] : vector<8x8xf32> to vector<8xf32>
    %58 = vector.shape_cast %57 : vector<8xf32> to vector<8x1xf32>
    %59 = tpu.reciprocal %58 {approx = true} : vector<8x1xf32> -> vector<8x1xf32>
    %60 = vector.broadcast %59 : vector<8x1xf32> to vector<8x8xf32>
    %61 = arith.mulf %56, %60 : vector<8x8xf32>
    %62 = arith.truncf %61 : vector<8x8xf32> to vector<8x8xbf16>
    %cst_24 = arith.constant dense<0.000000e+00> : vector<8x16xf32>
    %63 = tpu.matmul %62, %46, %cst_24 {dimension_numbers = #tpu.dot_dimension_numbers<[1], [0], [0], [1], [0, 0, 1, 1], [], []>} : vector<8x8xbf16>, vector<8x16xbf16>, vector<8x16xf32> -> vector<8x16xf32>
    %64 = vector.extract_strided_slice %38 {offsets = [0, 16], sizes = [8, 16], strides = [1, 1]} : vector<8x64xf32> to vector<8x16xf32>
    %65 = arith.truncf %64 : vector<8x16xf32> to vector<8x16xbf16>
    %66 = vector.extract_strided_slice %39 {offsets = [0, 16], sizes = [8, 16], strides = [1, 1]} : vector<8x64xf32> to vector<8x16xf32>
    %67 = arith.truncf %66 : vector<8x16xf32> to vector<8x16xbf16>
    %68 = vector.extract_strided_slice %40 {offsets = [0, 16], sizes = [8, 16], strides = [1, 1]} : vector<8x64xf32> to vector<8x16xf32>
    %69 = arith.truncf %68 : vector<8x16xf32> to vector<8x16xbf16>
    %cst_25 = arith.constant dense<0.000000e+00> : vector<8x8xf32>
    %70 = tpu.matmul %65, %67, %cst_25 {dimension_numbers = #tpu.dot_dimension_numbers<[1], [1], [0], [0], [0, 0, 1, 0], [], []>} : vector<8x16xbf16>, vector<8x16xbf16>, vector<8x8xf32> -> vector<8x8xf32>
    %cst_26 = arith.constant 2.500000e-01 : f32
    %71 = vector.broadcast %cst_26 : f32 to vector<8x8xf32>
    %72 = arith.mulf %70, %71 : vector<8x8xf32>
    %73 = vector.broadcast %3 : vector<1x8xf32> to vector<8x8xf32>
    %74 = arith.addf %72, %73 : vector<8x8xf32>
    %cst_27 = arith.constant dense<0xFF800000> : vector<8xf32>
    %75 = vector.multi_reduction <maximumf>, %74, %cst_27 [1] : vector<8x8xf32> to vector<8xf32>
    %76 = vector.shape_cast %75 : vector<8xf32> to vector<8x1xf32>
    %77 = vector.broadcast %76 : vector<8x1xf32> to vector<8x8xf32>
    %78 = arith.subf %74, %77 : vector<8x8xf32>
    %79 = math.exp %78 : vector<8x8xf32>
    %cst_28 = arith.constant dense<0.000000e+00> : vector<8xf32>
    %80 = vector.multi_reduction <add>, %79, %cst_28 [1] : vector<8x8xf32> to vector<8xf32>
    %81 = vector.shape_cast %80 : vector<8xf32> to vector<8x1xf32>
    %82 = tpu.reciprocal %81 {approx = true} : vector<8x1xf32> -> vector<8x1xf32>
    %83 = vector.broadcast %82 : vector<8x1xf32> to vector<8x8xf32>
    %84 = arith.mulf %79, %83 : vector<8x8xf32>
    %85 = arith.truncf %84 : vector<8x8xf32> to vector<8x8xbf16>
    %cst_29 = arith.constant dense<0.000000e+00> : vector<8x16xf32>
    %86 = tpu.matmul %85, %69, %cst_29 {dimension_numbers = #tpu.dot_dimension_numbers<[1], [0], [0], [1], [0, 0, 1, 1], [], []>} : vector<8x8xbf16>, vector<8x16xbf16>, vector<8x16xf32> -> vector<8x16xf32>
    %87 = vector.extract_strided_slice %38 {offsets = [0, 32], sizes = [8, 16], strides = [1, 1]} : vector<8x64xf32> to vector<8x16xf32>
    %88 = arith.truncf %87 : vector<8x16xf32> to vector<8x16xbf16>
    %89 = vector.extract_strided_slice %39 {offsets = [0, 32], sizes = [8, 16], strides = [1, 1]} : vector<8x64xf32> to vector<8x16xf32>
    %90 = arith.truncf %89 : vector<8x16xf32> to vector<8x16xbf16>
    %91 = vector.extract_strided_slice %40 {offsets = [0, 32], sizes = [8, 16], strides = [1, 1]} : vector<8x64xf32> to vector<8x16xf32>
    %92 = arith.truncf %91 : vector<8x16xf32> to vector<8x16xbf16>
    %cst_30 = arith.constant dense<0.000000e+00> : vector<8x8xf32>
    %93 = tpu.matmul %88, %90, %cst_30 {dimension_numbers = #tpu.dot_dimension_numbers<[1], [1], [0], [0], [0, 0, 1, 0], [], []>} : vector<8x16xbf16>, vector<8x16xbf16>, vector<8x8xf32> -> vector<8x8xf32>
    %cst_31 = arith.constant 2.500000e-01 : f32
    %94 = vector.broadcast %cst_31 : f32 to vector<8x8xf32>
    %95 = arith.mulf %93, %94 : vector<8x8xf32>
    %96 = vector.broadcast %3 : vector<1x8xf32> to vector<8x8xf32>
    %97 = arith.addf %95, %96 : vector<8x8xf32>
    %cst_32 = arith.constant dense<0xFF800000> : vector<8xf32>
    %98 = vector.multi_reduction <maximumf>, %97, %cst_32 [1] : vector<8x8xf32> to vector<8xf32>
    %99 = vector.shape_cast %98 : vector<8xf32> to vector<8x1xf32>
    %100 = vector.broadcast %99 : vector<8x1xf32> to vector<8x8xf32>
    %101 = arith.subf %97, %100 : vector<8x8xf32>
    %102 = math.exp %101 : vector<8x8xf32>
    %cst_33 = arith.constant dense<0.000000e+00> : vector<8xf32>
    %103 = vector.multi_reduction <add>, %102, %cst_33 [1] : vector<8x8xf32> to vector<8xf32>
    %104 = vector.shape_cast %103 : vector<8xf32> to vector<8x1xf32>
    %105 = tpu.reciprocal %104 {approx = true} : vector<8x1xf32> -> vector<8x1xf32>
    %106 = vector.broadcast %105 : vector<8x1xf32> to vector<8x8xf32>
    %107 = arith.mulf %102, %106 : vector<8x8xf32>
    %108 = arith.truncf %107 : vector<8x8xf32> to vector<8x8xbf16>
    %cst_34 = arith.constant dense<0.000000e+00> : vector<8x16xf32>
    %109 = tpu.matmul %108, %92, %cst_34 {dimension_numbers = #tpu.dot_dimension_numbers<[1], [0], [0], [1], [0, 0, 1, 1], [], []>} : vector<8x8xbf16>, vector<8x16xbf16>, vector<8x16xf32> -> vector<8x16xf32>
    %110 = vector.extract_strided_slice %38 {offsets = [0, 48], sizes = [8, 16], strides = [1, 1]} : vector<8x64xf32> to vector<8x16xf32>
    %111 = arith.truncf %110 : vector<8x16xf32> to vector<8x16xbf16>
    %112 = vector.extract_strided_slice %39 {offsets = [0, 48], sizes = [8, 16], strides = [1, 1]} : vector<8x64xf32> to vector<8x16xf32>
    %113 = arith.truncf %112 : vector<8x16xf32> to vector<8x16xbf16>
    %114 = vector.extract_strided_slice %40 {offsets = [0, 48], sizes = [8, 16], strides = [1, 1]} : vector<8x64xf32> to vector<8x16xf32>
    %115 = arith.truncf %114 : vector<8x16xf32> to vector<8x16xbf16>
    %cst_35 = arith.constant dense<0.000000e+00> : vector<8x8xf32>
    %116 = tpu.matmul %111, %113, %cst_35 {dimension_numbers = #tpu.dot_dimension_numbers<[1], [1], [0], [0], [0, 0, 1, 0], [], []>} : vector<8x16xbf16>, vector<8x16xbf16>, vector<8x8xf32> -> vector<8x8xf32>
    %cst_36 = arith.constant 2.500000e-01 : f32
    %117 = vector.broadcast %cst_36 : f32 to vector<8x8xf32>
    %118 = arith.mulf %116, %117 : vector<8x8xf32>
    %119 = vector.broadcast %3 : vector<1x8xf32> to vector<8x8xf32>
    %120 = arith.addf %118, %119 : vector<8x8xf32>
    %cst_37 = arith.constant dense<0xFF800000> : vector<8xf32>
    %121 = vector.multi_reduction <maximumf>, %120, %cst_37 [1] : vector<8x8xf32> to vector<8xf32>
    %122 = vector.shape_cast %121 : vector<8xf32> to vector<8x1xf32>
    %123 = vector.broadcast %122 : vector<8x1xf32> to vector<8x8xf32>
    %124 = arith.subf %120, %123 : vector<8x8xf32>
    %125 = math.exp %124 : vector<8x8xf32>
    %cst_38 = arith.constant dense<0.000000e+00> : vector<8xf32>
    %126 = vector.multi_reduction <add>, %125, %cst_38 [1] : vector<8x8xf32> to vector<8xf32>
    %127 = vector.shape_cast %126 : vector<8xf32> to vector<8x1xf32>
    %128 = tpu.reciprocal %127 {approx = true} : vector<8x1xf32> -> vector<8x1xf32>
    %129 = vector.broadcast %128 : vector<8x1xf32> to vector<8x8xf32>
    %130 = arith.mulf %125, %129 : vector<8x8xf32>
    %131 = arith.truncf %130 : vector<8x8xf32> to vector<8x8xbf16>
    %cst_39 = arith.constant dense<0.000000e+00> : vector<8x16xf32>
    %132 = tpu.matmul %131, %115, %cst_39 {dimension_numbers = #tpu.dot_dimension_numbers<[1], [0], [0], [1], [0, 0, 1, 1], [], []>} : vector<8x8xbf16>, vector<8x16xbf16>, vector<8x16xf32> -> vector<8x16xf32>
    %133 = tpu.concatenate %63, %86, %109, %132 in 1 : vector<8x16xf32>, vector<8x16xf32>, vector<8x16xf32>, vector<8x16xf32> -> vector<8x64xf32>
    %c0_40 = arith.constant 0 : index
    %c0_41 = arith.constant 0 : index
    %c0_42 = arith.constant 0 : index
    %134 = vector.load %arg7[%c0_40, %c0_41, %c0_42] : memref<2x64x64xbf16, #tpu.memory_space<vmem>>, vector<1x64x64xbf16>
    %135 = vector.shape_cast %134 : vector<1x64x64xbf16> to vector<64x64xbf16>
    %136 = arith.truncf %133 : vector<8x64xf32> to vector<8x64xbf16>
    %cst_43 = arith.constant dense<0.000000e+00> : vector<8x64xf32>
    %137 = tpu.matmul %136, %135, %cst_43 {dimension_numbers = #tpu.dot_dimension_numbers<[1], [0], [0], [1], [0, 0, 1, 1], [], []>} : vector<8x64xbf16>, vector<64x64xbf16>, vector<8x64xf32> -> vector<8x64xf32>
    %c0_44 = arith.constant 0 : index
    %c0_45 = arith.constant 0 : index
    %c0_46 = arith.constant 0 : index
    %138 = vector.load %arg8[%c0_44, %c0_45, %c0_46] : memref<2x1x64xf32, #tpu.memory_space<vmem>>, vector<1x1x64xf32>
    %139 = vector.shape_cast %138 : vector<1x1x64xf32> to vector<1x64xf32>
    %140 = vector.broadcast %139 : vector<1x64xf32> to vector<8x64xf32>
    %141 = arith.addf %137, %140 : vector<8x64xf32>
    %142 = arith.addf %141, %29 : vector<8x64xf32>
    %c0_47 = arith.constant 0 : index
    %c0_48 = arith.constant 0 : index
    %c0_49 = arith.constant 0 : index
    %143 = vector.load %arg9[%c0_47, %c0_48, %c0_49] : memref<2x1x64xf32, #tpu.memory_space<vmem>>, vector<1x1x64xf32>
    %144 = vector.shape_cast %143 : vector<1x1x64xf32> to vector<1x64xf32>
    %c0_50 = arith.constant 0 : index
    %c0_51 = arith.constant 0 : index
    %c0_52 = arith.constant 0 : index
    %145 = vector.load %arg10[%c0_50, %c0_51, %c0_52] : memref<2x1x64xf32, #tpu.memory_space<vmem>>, vector<1x1x64xf32>
    %146 = vector.shape_cast %145 : vector<1x1x64xf32> to vector<1x64xf32>
    %cst_53 = arith.constant dense<0.000000e+00> : vector<8xf32>
    %147 = vector.multi_reduction <add>, %142, %cst_53 [1] : vector<8x64xf32> to vector<8xf32>
    %148 = vector.shape_cast %147 : vector<8xf32> to vector<8x1xf32>
    %cst_54 = arith.constant 6.400000e+01 : f32
    %149 = vector.broadcast %cst_54 : f32 to vector<8x1xf32>
    %150 = arith.divf %148, %149 : vector<8x1xf32>
    %151 = vector.broadcast %150 : vector<8x1xf32> to vector<8x64xf32>
    %152 = arith.subf %142, %151 : vector<8x64xf32>
    %153 = vector.broadcast %150 : vector<8x1xf32> to vector<8x64xf32>
    %154 = arith.subf %142, %153 : vector<8x64xf32>
    %155 = arith.mulf %152, %154 : vector<8x64xf32>
    %cst_55 = arith.constant dense<0.000000e+00> : vector<8xf32>
    %156 = vector.multi_reduction <add>, %155, %cst_55 [1] : vector<8x64xf32> to vector<8xf32>
    %157 = vector.shape_cast %156 : vector<8xf32> to vector<8x1xf32>
    %cst_56 = arith.constant 6.400000e+01 : f32
    %158 = vector.broadcast %cst_56 : f32 to vector<8x1xf32>
    %159 = arith.divf %157, %158 : vector<8x1xf32>
    %160 = vector.broadcast %150 : vector<8x1xf32> to vector<8x64xf32>
    %161 = arith.subf %142, %160 : vector<8x64xf32>
    %cst_57 = arith.constant 9.99999996E-13 : f32
    %162 = vector.broadcast %cst_57 : f32 to vector<8x1xf32>
    %163 = arith.addf %159, %162 : vector<8x1xf32>
    %164 = math.rsqrt %163 : vector<8x1xf32>
    %165 = vector.broadcast %164 : vector<8x1xf32> to vector<8x64xf32>
    %166 = arith.mulf %161, %165 : vector<8x64xf32>
    %167 = vector.broadcast %144 : vector<1x64xf32> to vector<8x64xf32>
    %168 = arith.mulf %166, %167 : vector<8x64xf32>
    %169 = vector.broadcast %146 : vector<1x64xf32> to vector<8x64xf32>
    %170 = arith.addf %168, %169 : vector<8x64xf32>
    %c0_58 = arith.constant 0 : index
    %c0_59 = arith.constant 0 : index
    %c0_60 = arith.constant 0 : index
    %171 = vector.load %arg11[%c0_58, %c0_59, %c0_60] : memref<2x64x128xbf16, #tpu.memory_space<vmem>>, vector<1x64x128xbf16>
    %172 = vector.shape_cast %171 : vector<1x64x128xbf16> to vector<64x128xbf16>
    %173 = arith.truncf %170 : vector<8x64xf32> to vector<8x64xbf16>
    %cst_61 = arith.constant dense<0.000000e+00> : vector<8x128xf32>
    %174 = tpu.matmul %173, %172, %cst_61 {dimension_numbers = #tpu.dot_dimension_numbers<[1], [0], [0], [1], [0, 0, 1, 1], [], []>} : vector<8x64xbf16>, vector<64x128xbf16>, vector<8x128xf32> -> vector<8x128xf32>
    %c0_62 = arith.constant 0 : index
    %c0_63 = arith.constant 0 : index
    %c0_64 = arith.constant 0 : index
    %175 = vector.load %arg12[%c0_62, %c0_63, %c0_64] : memref<2x1x128xf32, #tpu.memory_space<vmem>>, vector<1x1x128xf32>
    %176 = vector.shape_cast %175 : vector<1x1x128xf32> to vector<1x128xf32>
    %177 = vector.broadcast %176 : vector<1x128xf32> to vector<8x128xf32>
    %178 = arith.addf %174, %177 : vector<8x128xf32>
    %179 = arith.mulf %178, %178 : vector<8x128xf32>
    %180 = arith.mulf %178, %179 : vector<8x128xf32>
    %cst_65 = arith.constant 4.471500e-02 : f32
    %181 = vector.broadcast %cst_65 : f32 to vector<8x128xf32>
    %182 = arith.mulf %181, %180 : vector<8x128xf32>
    %183 = arith.addf %178, %182 : vector<8x128xf32>
    %cst_66 = arith.constant 0.797884583 : f32
    %184 = vector.broadcast %cst_66 : f32 to vector<8x128xf32>
    %185 = arith.mulf %184, %183 : vector<8x128xf32>
    %186 = math.tanh %185 : vector<8x128xf32>
    %cst_67 = arith.constant 1.000000e+00 : f32
    %187 = vector.broadcast %cst_67 : f32 to vector<8x128xf32>
    %188 = arith.addf %187, %186 : vector<8x128xf32>
    %cst_68 = arith.constant 5.000000e-01 : f32
    %189 = vector.broadcast %cst_68 : f32 to vector<8x128xf32>
    %190 = arith.mulf %189, %188 : vector<8x128xf32>
    %191 = arith.mulf %178, %190 : vector<8x128xf32>
    %c0_69 = arith.constant 0 : index
    %c0_70 = arith.constant 0 : index
    %c0_71 = arith.constant 0 : index
    %192 = vector.load %arg13[%c0_69, %c0_70, %c0_71] : memref<2x128x64xbf16, #tpu.memory_space<vmem>>, vector<1x128x64xbf16>
    %193 = vector.shape_cast %192 : vector<1x128x64xbf16> to vector<128x64xbf16>
    %194 = arith.truncf %191 : vector<8x128xf32> to vector<8x128xbf16>
    %cst_72 = arith.constant dense<0.000000e+00> : vector<8x64xf32>
    %195 = tpu.matmul %194, %193, %cst_72 {dimension_numbers = #tpu.dot_dimension_numbers<[1], [0], [0], [1], [0, 0, 1, 1], [], []>} : vector<8x128xbf16>, vector<128x64xbf16>, vector<8x64xf32> -> vector<8x64xf32>
    %c0_73 = arith.constant 0 : index
    %c0_74 = arith.constant 0 : index
    %c0_75 = arith.constant 0 : index
    %196 = vector.load %arg14[%c0_73, %c0_74, %c0_75] : memref<2x1x64xf32, #tpu.memory_space<vmem>>, vector<1x1x64xf32>
    %197 = vector.shape_cast %196 : vector<1x1x64xf32> to vector<1x64xf32>
    %198 = vector.broadcast %197 : vector<1x64xf32> to vector<8x64xf32>
    %199 = arith.addf %195, %198 : vector<8x64xf32>
    %200 = arith.addf %199, %170 : vector<8x64xf32>
    %c0_76 = arith.constant 0 : index
    %c0_77 = arith.constant 0 : index
    %c0_78 = arith.constant 0 : index
    %201 = vector.load %arg15[%c0_76, %c0_77, %c0_78] : memref<2x1x64xf32, #tpu.memory_space<vmem>>, vector<1x1x64xf32>
    %202 = vector.shape_cast %201 : vector<1x1x64xf32> to vector<1x64xf32>
    %c0_79 = arith.constant 0 : index
    %c0_80 = arith.constant 0 : index
    %c0_81 = arith.constant 0 : index
    %203 = vector.load %arg16[%c0_79, %c0_80, %c0_81] : memref<2x1x64xf32, #tpu.memory_space<vmem>>, vector<1x1x64xf32>
    %204 = vector.shape_cast %203 : vector<1x1x64xf32> to vector<1x64xf32>
    %cst_82 = arith.constant dense<0.000000e+00> : vector<8xf32>
    %205 = vector.multi_reduction <add>, %200, %cst_82 [1] : vector<8x64xf32> to vector<8xf32>
    %206 = vector.shape_cast %205 : vector<8xf32> to vector<8x1xf32>
    %cst_83 = arith.constant 6.400000e+01 : f32
    %207 = vector.broadcast %cst_83 : f32 to vector<8x1xf32>
    %208 = arith.divf %206, %207 : vector<8x1xf32>
    %209 = vector.broadcast %208 : vector<8x1xf32> to vector<8x64xf32>
    %210 = arith.subf %200, %209 : vector<8x64xf32>
    %211 = vector.broadcast %208 : vector<8x1xf32> to vector<8x64xf32>
    %212 = arith.subf %200, %211 : vector<8x64xf32>
    %213 = arith.mulf %210, %212 : vector<8x64xf32>
    %cst_84 = arith.constant dense<0.000000e+00> : vector<8xf32>
    %214 = vector.multi_reduction <add>, %213, %cst_84 [1] : vector<8x64xf32> to vector<8xf32>
    %215 = vector.shape_cast %214 : vector<8xf32> to vector<8x1xf32>
    %cst_85 = arith.constant 6.400000e+01 : f32
    %216 = vector.broadcast %cst_85 : f32 to vector<8x1xf32>
    %217 = arith.divf %215, %216 : vector<8x1xf32>
    %218 = vector.broadcast %208 : vector<8x1xf32> to vector<8x64xf32>
    %219 = arith.subf %200, %218 : vector<8x64xf32>
    %cst_86 = arith.constant 9.99999996E-13 : f32
    %220 = vector.broadcast %cst_86 : f32 to vector<8x1xf32>
    %221 = arith.addf %217, %220 : vector<8x1xf32>
    %222 = math.rsqrt %221 : vector<8x1xf32>
    %223 = vector.broadcast %222 : vector<8x1xf32> to vector<8x64xf32>
    %224 = arith.mulf %219, %223 : vector<8x64xf32>
    %225 = vector.broadcast %202 : vector<1x64xf32> to vector<8x64xf32>
    %226 = arith.mulf %224, %225 : vector<8x64xf32>
    %227 = vector.broadcast %204 : vector<1x64xf32> to vector<8x64xf32>
    %228 = arith.addf %226, %227 : vector<8x64xf32>
    %c1 = arith.constant 1 : index
    %c0_87 = arith.constant 0 : index
    %c0_88 = arith.constant 0 : index
    %229 = vector.load %arg5[%c1, %c0_87, %c0_88] : memref<2x64x192xbf16, #tpu.memory_space<vmem>>, vector<1x64x192xbf16>
    %230 = vector.shape_cast %229 : vector<1x64x192xbf16> to vector<64x192xbf16>
    %231 = arith.truncf %228 : vector<8x64xf32> to vector<8x64xbf16>
    %cst_89 = arith.constant dense<0.000000e+00> : vector<8x192xf32>
    %232 = tpu.matmul %231, %230, %cst_89 {dimension_numbers = #tpu.dot_dimension_numbers<[1], [0], [0], [1], [0, 0, 1, 1], [], []>} : vector<8x64xbf16>, vector<64x192xbf16>, vector<8x192xf32> -> vector<8x192xf32>
    %c1_90 = arith.constant 1 : index
    %c0_91 = arith.constant 0 : index
    %c0_92 = arith.constant 0 : index
    %233 = vector.load %arg6[%c1_90, %c0_91, %c0_92] : memref<2x1x192xf32, #tpu.memory_space<vmem>>, vector<1x1x192xf32>
    %234 = vector.shape_cast %233 : vector<1x1x192xf32> to vector<1x192xf32>
    %235 = vector.broadcast %234 : vector<1x192xf32> to vector<8x192xf32>
    %236 = arith.addf %232, %235 : vector<8x192xf32>
    %237 = vector.extract_strided_slice %236 {offsets = [0, 0], sizes = [8, 64], strides = [1, 1]} : vector<8x192xf32> to vector<8x64xf32>
    %238 = vector.extract_strided_slice %236 {offsets = [0, 64], sizes = [8, 64], strides = [1, 1]} : vector<8x192xf32> to vector<8x64xf32>
    %239 = vector.extract_strided_slice %236 {offsets = [0, 128], sizes = [8, 64], strides = [1, 1]} : vector<8x192xf32> to vector<8x64xf32>
    %240 = vector.extract_strided_slice %237 {offsets = [0, 0], sizes = [8, 16], strides = [1, 1]} : vector<8x64xf32> to vector<8x16xf32>
    %241 = arith.truncf %240 : vector<8x16xf32> to vector<8x16xbf16>
    %242 = vector.extract_strided_slice %238 {offsets = [0, 0], sizes = [8, 16], strides = [1, 1]} : vector<8x64xf32> to vector<8x16xf32>
    %243 = arith.truncf %242 : vector<8x16xf32> to vector<8x16xbf16>
    %244 = vector.extract_strided_slice %239 {offsets = [0, 0], sizes = [8, 16], strides = [1, 1]} : vector<8x64xf32> to vector<8x16xf32>
    %245 = arith.truncf %244 : vector<8x16xf32> to vector<8x16xbf16>
    %cst_93 = arith.constant dense<0.000000e+00> : vector<8x8xf32>
    %246 = tpu.matmul %241, %243, %cst_93 {dimension_numbers = #tpu.dot_dimension_numbers<[1], [1], [0], [0], [0, 0, 1, 0], [], []>} : vector<8x16xbf16>, vector<8x16xbf16>, vector<8x8xf32> -> vector<8x8xf32>
    %cst_94 = arith.constant 2.500000e-01 : f32
    %247 = vector.broadcast %cst_94 : f32 to vector<8x8xf32>
    %248 = arith.mulf %246, %247 : vector<8x8xf32>
    %249 = vector.broadcast %3 : vector<1x8xf32> to vector<8x8xf32>
    %250 = arith.addf %248, %249 : vector<8x8xf32>
    %cst_95 = arith.constant dense<0xFF800000> : vector<8xf32>
    %251 = vector.multi_reduction <maximumf>, %250, %cst_95 [1] : vector<8x8xf32> to vector<8xf32>
    %252 = vector.shape_cast %251 : vector<8xf32> to vector<8x1xf32>
    %253 = vector.broadcast %252 : vector<8x1xf32> to vector<8x8xf32>
    %254 = arith.subf %250, %253 : vector<8x8xf32>
    %255 = math.exp %254 : vector<8x8xf32>
    %cst_96 = arith.constant dense<0.000000e+00> : vector<8xf32>
    %256 = vector.multi_reduction <add>, %255, %cst_96 [1] : vector<8x8xf32> to vector<8xf32>
    %257 = vector.shape_cast %256 : vector<8xf32> to vector<8x1xf32>
    %258 = tpu.reciprocal %257 {approx = true} : vector<8x1xf32> -> vector<8x1xf32>
    %259 = vector.broadcast %258 : vector<8x1xf32> to vector<8x8xf32>
    %260 = arith.mulf %255, %259 : vector<8x8xf32>
    %261 = arith.truncf %260 : vector<8x8xf32> to vector<8x8xbf16>
    %cst_97 = arith.constant dense<0.000000e+00> : vector<8x16xf32>
    %262 = tpu.matmul %261, %245, %cst_97 {dimension_numbers = #tpu.dot_dimension_numbers<[1], [0], [0], [1], [0, 0, 1, 1], [], []>} : vector<8x8xbf16>, vector<8x16xbf16>, vector<8x16xf32> -> vector<8x16xf32>
    %263 = vector.extract_strided_slice %237 {offsets = [0, 16], sizes = [8, 16], strides = [1, 1]} : vector<8x64xf32> to vector<8x16xf32>
    %264 = arith.truncf %263 : vector<8x16xf32> to vector<8x16xbf16>
    %265 = vector.extract_strided_slice %238 {offsets = [0, 16], sizes = [8, 16], strides = [1, 1]} : vector<8x64xf32> to vector<8x16xf32>
    %266 = arith.truncf %265 : vector<8x16xf32> to vector<8x16xbf16>
    %267 = vector.extract_strided_slice %239 {offsets = [0, 16], sizes = [8, 16], strides = [1, 1]} : vector<8x64xf32> to vector<8x16xf32>
    %268 = arith.truncf %267 : vector<8x16xf32> to vector<8x16xbf16>
    %cst_98 = arith.constant dense<0.000000e+00> : vector<8x8xf32>
    %269 = tpu.matmul %264, %266, %cst_98 {dimension_numbers = #tpu.dot_dimension_numbers<[1], [1], [0], [0], [0, 0, 1, 0], [], []>} : vector<8x16xbf16>, vector<8x16xbf16>, vector<8x8xf32> -> vector<8x8xf32>
    %cst_99 = arith.constant 2.500000e-01 : f32
    %270 = vector.broadcast %cst_99 : f32 to vector<8x8xf32>
    %271 = arith.mulf %269, %270 : vector<8x8xf32>
    %272 = vector.broadcast %3 : vector<1x8xf32> to vector<8x8xf32>
    %273 = arith.addf %271, %272 : vector<8x8xf32>
    %cst_100 = arith.constant dense<0xFF800000> : vector<8xf32>
    %274 = vector.multi_reduction <maximumf>, %273, %cst_100 [1] : vector<8x8xf32> to vector<8xf32>
    %275 = vector.shape_cast %274 : vector<8xf32> to vector<8x1xf32>
    %276 = vector.broadcast %275 : vector<8x1xf32> to vector<8x8xf32>
    %277 = arith.subf %273, %276 : vector<8x8xf32>
    %278 = math.exp %277 : vector<8x8xf32>
    %cst_101 = arith.constant dense<0.000000e+00> : vector<8xf32>
    %279 = vector.multi_reduction <add>, %278, %cst_101 [1] : vector<8x8xf32> to vector<8xf32>
    %280 = vector.shape_cast %279 : vector<8xf32> to vector<8x1xf32>
    %281 = tpu.reciprocal %280 {approx = true} : vector<8x1xf32> -> vector<8x1xf32>
    %282 = vector.broadcast %281 : vector<8x1xf32> to vector<8x8xf32>
    %283 = arith.mulf %278, %282 : vector<8x8xf32>
    %284 = arith.truncf %283 : vector<8x8xf32> to vector<8x8xbf16>
    %cst_102 = arith.constant dense<0.000000e+00> : vector<8x16xf32>
    %285 = tpu.matmul %284, %268, %cst_102 {dimension_numbers = #tpu.dot_dimension_numbers<[1], [0], [0], [1], [0, 0, 1, 1], [], []>} : vector<8x8xbf16>, vector<8x16xbf16>, vector<8x16xf32> -> vector<8x16xf32>
    %286 = vector.extract_strided_slice %237 {offsets = [0, 32], sizes = [8, 16], strides = [1, 1]} : vector<8x64xf32> to vector<8x16xf32>
    %287 = arith.truncf %286 : vector<8x16xf32> to vector<8x16xbf16>
    %288 = vector.extract_strided_slice %238 {offsets = [0, 32], sizes = [8, 16], strides = [1, 1]} : vector<8x64xf32> to vector<8x16xf32>
    %289 = arith.truncf %288 : vector<8x16xf32> to vector<8x16xbf16>
    %290 = vector.extract_strided_slice %239 {offsets = [0, 32], sizes = [8, 16], strides = [1, 1]} : vector<8x64xf32> to vector<8x16xf32>
    %291 = arith.truncf %290 : vector<8x16xf32> to vector<8x16xbf16>
    %cst_103 = arith.constant dense<0.000000e+00> : vector<8x8xf32>
    %292 = tpu.matmul %287, %289, %cst_103 {dimension_numbers = #tpu.dot_dimension_numbers<[1], [1], [0], [0], [0, 0, 1, 0], [], []>} : vector<8x16xbf16>, vector<8x16xbf16>, vector<8x8xf32> -> vector<8x8xf32>
    %cst_104 = arith.constant 2.500000e-01 : f32
    %293 = vector.broadcast %cst_104 : f32 to vector<8x8xf32>
    %294 = arith.mulf %292, %293 : vector<8x8xf32>
    %295 = vector.broadcast %3 : vector<1x8xf32> to vector<8x8xf32>
    %296 = arith.addf %294, %295 : vector<8x8xf32>
    %cst_105 = arith.constant dense<0xFF800000> : vector<8xf32>
    %297 = vector.multi_reduction <maximumf>, %296, %cst_105 [1] : vector<8x8xf32> to vector<8xf32>
    %298 = vector.shape_cast %297 : vector<8xf32> to vector<8x1xf32>
    %299 = vector.broadcast %298 : vector<8x1xf32> to vector<8x8xf32>
    %300 = arith.subf %296, %299 : vector<8x8xf32>
    %301 = math.exp %300 : vector<8x8xf32>
    %cst_106 = arith.constant dense<0.000000e+00> : vector<8xf32>
    %302 = vector.multi_reduction <add>, %301, %cst_106 [1] : vector<8x8xf32> to vector<8xf32>
    %303 = vector.shape_cast %302 : vector<8xf32> to vector<8x1xf32>
    %304 = tpu.reciprocal %303 {approx = true} : vector<8x1xf32> -> vector<8x1xf32>
    %305 = vector.broadcast %304 : vector<8x1xf32> to vector<8x8xf32>
    %306 = arith.mulf %301, %305 : vector<8x8xf32>
    %307 = arith.truncf %306 : vector<8x8xf32> to vector<8x8xbf16>
    %cst_107 = arith.constant dense<0.000000e+00> : vector<8x16xf32>
    %308 = tpu.matmul %307, %291, %cst_107 {dimension_numbers = #tpu.dot_dimension_numbers<[1], [0], [0], [1], [0, 0, 1, 1], [], []>} : vector<8x8xbf16>, vector<8x16xbf16>, vector<8x16xf32> -> vector<8x16xf32>
    %309 = vector.extract_strided_slice %237 {offsets = [0, 48], sizes = [8, 16], strides = [1, 1]} : vector<8x64xf32> to vector<8x16xf32>
    %310 = arith.truncf %309 : vector<8x16xf32> to vector<8x16xbf16>
    %311 = vector.extract_strided_slice %238 {offsets = [0, 48], sizes = [8, 16], strides = [1, 1]} : vector<8x64xf32> to vector<8x16xf32>
    %312 = arith.truncf %311 : vector<8x16xf32> to vector<8x16xbf16>
    %313 = vector.extract_strided_slice %239 {offsets = [0, 48], sizes = [8, 16], strides = [1, 1]} : vector<8x64xf32> to vector<8x16xf32>
    %314 = arith.truncf %313 : vector<8x16xf32> to vector<8x16xbf16>
    %cst_108 = arith.constant dense<0.000000e+00> : vector<8x8xf32>
    %315 = tpu.matmul %310, %312, %cst_108 {dimension_numbers = #tpu.dot_dimension_numbers<[1], [1], [0], [0], [0, 0, 1, 0], [], []>} : vector<8x16xbf16>, vector<8x16xbf16>, vector<8x8xf32> -> vector<8x8xf32>
    %cst_109 = arith.constant 2.500000e-01 : f32
    %316 = vector.broadcast %cst_109 : f32 to vector<8x8xf32>
    %317 = arith.mulf %315, %316 : vector<8x8xf32>
    %318 = vector.broadcast %3 : vector<1x8xf32> to vector<8x8xf32>
    %319 = arith.addf %317, %318 : vector<8x8xf32>
    %cst_110 = arith.constant dense<0xFF800000> : vector<8xf32>
    %320 = vector.multi_reduction <maximumf>, %319, %cst_110 [1] : vector<8x8xf32> to vector<8xf32>
    %321 = vector.shape_cast %320 : vector<8xf32> to vector<8x1xf32>
    %322 = vector.broadcast %321 : vector<8x1xf32> to vector<8x8xf32>
    %323 = arith.subf %319, %322 : vector<8x8xf32>
    %324 = math.exp %323 : vector<8x8xf32>
    %cst_111 = arith.constant dense<0.000000e+00> : vector<8xf32>
    %325 = vector.multi_reduction <add>, %324, %cst_111 [1] : vector<8x8xf32> to vector<8xf32>
    %326 = vector.shape_cast %325 : vector<8xf32> to vector<8x1xf32>
    %327 = tpu.reciprocal %326 {approx = true} : vector<8x1xf32> -> vector<8x1xf32>
    %328 = vector.broadcast %327 : vector<8x1xf32> to vector<8x8xf32>
    %329 = arith.mulf %324, %328 : vector<8x8xf32>
    %330 = arith.truncf %329 : vector<8x8xf32> to vector<8x8xbf16>
    %cst_112 = arith.constant dense<0.000000e+00> : vector<8x16xf32>
    %331 = tpu.matmul %330, %314, %cst_112 {dimension_numbers = #tpu.dot_dimension_numbers<[1], [0], [0], [1], [0, 0, 1, 1], [], []>} : vector<8x8xbf16>, vector<8x16xbf16>, vector<8x16xf32> -> vector<8x16xf32>
    %332 = tpu.concatenate %262, %285, %308, %331 in 1 : vector<8x16xf32>, vector<8x16xf32>, vector<8x16xf32>, vector<8x16xf32> -> vector<8x64xf32>
    %c1_113 = arith.constant 1 : index
    %c0_114 = arith.constant 0 : index
    %c0_115 = arith.constant 0 : index
    %333 = vector.load %arg7[%c1_113, %c0_114, %c0_115] : memref<2x64x64xbf16, #tpu.memory_space<vmem>>, vector<1x64x64xbf16>
    %334 = vector.shape_cast %333 : vector<1x64x64xbf16> to vector<64x64xbf16>
    %335 = arith.truncf %332 : vector<8x64xf32> to vector<8x64xbf16>
    %cst_116 = arith.constant dense<0.000000e+00> : vector<8x64xf32>
    %336 = tpu.matmul %335, %334, %cst_116 {dimension_numbers = #tpu.dot_dimension_numbers<[1], [0], [0], [1], [0, 0, 1, 1], [], []>} : vector<8x64xbf16>, vector<64x64xbf16>, vector<8x64xf32> -> vector<8x64xf32>
    %c1_117 = arith.constant 1 : index
    %c0_118 = arith.constant 0 : index
    %c0_119 = arith.constant 0 : index
    %337 = vector.load %arg8[%c1_117, %c0_118, %c0_119] : memref<2x1x64xf32, #tpu.memory_space<vmem>>, vector<1x1x64xf32>
    %338 = vector.shape_cast %337 : vector<1x1x64xf32> to vector<1x64xf32>
    %339 = vector.broadcast %338 : vector<1x64xf32> to vector<8x64xf32>
    %340 = arith.addf %336, %339 : vector<8x64xf32>
    %341 = arith.addf %340, %228 : vector<8x64xf32>
    %c1_120 = arith.constant 1 : index
    %c0_121 = arith.constant 0 : index
    %c0_122 = arith.constant 0 : index
    %342 = vector.load %arg9[%c1_120, %c0_121, %c0_122] : memref<2x1x64xf32, #tpu.memory_space<vmem>>, vector<1x1x64xf32>
    %343 = vector.shape_cast %342 : vector<1x1x64xf32> to vector<1x64xf32>
    %c1_123 = arith.constant 1 : index
    %c0_124 = arith.constant 0 : index
    %c0_125 = arith.constant 0 : index
    %344 = vector.load %arg10[%c1_123, %c0_124, %c0_125] : memref<2x1x64xf32, #tpu.memory_space<vmem>>, vector<1x1x64xf32>
    %345 = vector.shape_cast %344 : vector<1x1x64xf32> to vector<1x64xf32>
    %cst_126 = arith.constant dense<0.000000e+00> : vector<8xf32>
    %346 = vector.multi_reduction <add>, %341, %cst_126 [1] : vector<8x64xf32> to vector<8xf32>
    %347 = vector.shape_cast %346 : vector<8xf32> to vector<8x1xf32>
    %cst_127 = arith.constant 6.400000e+01 : f32
    %348 = vector.broadcast %cst_127 : f32 to vector<8x1xf32>
    %349 = arith.divf %347, %348 : vector<8x1xf32>
    %350 = vector.broadcast %349 : vector<8x1xf32> to vector<8x64xf32>
    %351 = arith.subf %341, %350 : vector<8x64xf32>
    %352 = vector.broadcast %349 : vector<8x1xf32> to vector<8x64xf32>
    %353 = arith.subf %341, %352 : vector<8x64xf32>
    %354 = arith.mulf %351, %353 : vector<8x64xf32>
    %cst_128 = arith.constant dense<0.000000e+00> : vector<8xf32>
    %355 = vector.multi_reduction <add>, %354, %cst_128 [1] : vector<8x64xf32> to vector<8xf32>
    %356 = vector.shape_cast %355 : vector<8xf32> to vector<8x1xf32>
    %cst_129 = arith.constant 6.400000e+01 : f32
    %357 = vector.broadcast %cst_129 : f32 to vector<8x1xf32>
    %358 = arith.divf %356, %357 : vector<8x1xf32>
    %359 = vector.broadcast %349 : vector<8x1xf32> to vector<8x64xf32>
    %360 = arith.subf %341, %359 : vector<8x64xf32>
    %cst_130 = arith.constant 9.99999996E-13 : f32
    %361 = vector.broadcast %cst_130 : f32 to vector<8x1xf32>
    %362 = arith.addf %358, %361 : vector<8x1xf32>
    %363 = math.rsqrt %362 : vector<8x1xf32>
    %364 = vector.broadcast %363 : vector<8x1xf32> to vector<8x64xf32>
    %365 = arith.mulf %360, %364 : vector<8x64xf32>
    %366 = vector.broadcast %343 : vector<1x64xf32> to vector<8x64xf32>
    %367 = arith.mulf %365, %366 : vector<8x64xf32>
    %368 = vector.broadcast %345 : vector<1x64xf32> to vector<8x64xf32>
    %369 = arith.addf %367, %368 : vector<8x64xf32>
    %c1_131 = arith.constant 1 : index
    %c0_132 = arith.constant 0 : index
    %c0_133 = arith.constant 0 : index
    %370 = vector.load %arg11[%c1_131, %c0_132, %c0_133] : memref<2x64x128xbf16, #tpu.memory_space<vmem>>, vector<1x64x128xbf16>
    %371 = vector.shape_cast %370 : vector<1x64x128xbf16> to vector<64x128xbf16>
    %372 = arith.truncf %369 : vector<8x64xf32> to vector<8x64xbf16>
    %cst_134 = arith.constant dense<0.000000e+00> : vector<8x128xf32>
    %373 = tpu.matmul %372, %371, %cst_134 {dimension_numbers = #tpu.dot_dimension_numbers<[1], [0], [0], [1], [0, 0, 1, 1], [], []>} : vector<8x64xbf16>, vector<64x128xbf16>, vector<8x128xf32> -> vector<8x128xf32>
    %c1_135 = arith.constant 1 : index
    %c0_136 = arith.constant 0 : index
    %c0_137 = arith.constant 0 : index
    %374 = vector.load %arg12[%c1_135, %c0_136, %c0_137] : memref<2x1x128xf32, #tpu.memory_space<vmem>>, vector<1x1x128xf32>
    %375 = vector.shape_cast %374 : vector<1x1x128xf32> to vector<1x128xf32>
    %376 = vector.broadcast %375 : vector<1x128xf32> to vector<8x128xf32>
    %377 = arith.addf %373, %376 : vector<8x128xf32>
    %378 = arith.mulf %377, %377 : vector<8x128xf32>
    %379 = arith.mulf %377, %378 : vector<8x128xf32>
    %cst_138 = arith.constant 4.471500e-02 : f32
    %380 = vector.broadcast %cst_138 : f32 to vector<8x128xf32>
    %381 = arith.mulf %380, %379 : vector<8x128xf32>
    %382 = arith.addf %377, %381 : vector<8x128xf32>
    %cst_139 = arith.constant 0.797884583 : f32
    %383 = vector.broadcast %cst_139 : f32 to vector<8x128xf32>
    %384 = arith.mulf %383, %382 : vector<8x128xf32>
    %385 = math.tanh %384 : vector<8x128xf32>
    %cst_140 = arith.constant 1.000000e+00 : f32
    %386 = vector.broadcast %cst_140 : f32 to vector<8x128xf32>
    %387 = arith.addf %386, %385 : vector<8x128xf32>
    %cst_141 = arith.constant 5.000000e-01 : f32
    %388 = vector.broadcast %cst_141 : f32 to vector<8x128xf32>
    %389 = arith.mulf %388, %387 : vector<8x128xf32>
    %390 = arith.mulf %377, %389 : vector<8x128xf32>
    %c1_142 = arith.constant 1 : index
    %c0_143 = arith.constant 0 : index
    %c0_144 = arith.constant 0 : index
    %391 = vector.load %arg13[%c1_142, %c0_143, %c0_144] : memref<2x128x64xbf16, #tpu.memory_space<vmem>>, vector<1x128x64xbf16>
    %392 = vector.shape_cast %391 : vector<1x128x64xbf16> to vector<128x64xbf16>
    %393 = arith.truncf %390 : vector<8x128xf32> to vector<8x128xbf16>
    %cst_145 = arith.constant dense<0.000000e+00> : vector<8x64xf32>
    %394 = tpu.matmul %393, %392, %cst_145 {dimension_numbers = #tpu.dot_dimension_numbers<[1], [0], [0], [1], [0, 0, 1, 1], [], []>} : vector<8x128xbf16>, vector<128x64xbf16>, vector<8x64xf32> -> vector<8x64xf32>
    %c1_146 = arith.constant 1 : index
    %c0_147 = arith.constant 0 : index
    %c0_148 = arith.constant 0 : index
    %395 = vector.load %arg14[%c1_146, %c0_147, %c0_148] : memref<2x1x64xf32, #tpu.memory_space<vmem>>, vector<1x1x64xf32>
    %396 = vector.shape_cast %395 : vector<1x1x64xf32> to vector<1x64xf32>
    %397 = vector.broadcast %396 : vector<1x64xf32> to vector<8x64xf32>
    %398 = arith.addf %394, %397 : vector<8x64xf32>
    %399 = arith.addf %398, %369 : vector<8x64xf32>
    %c1_149 = arith.constant 1 : index
    %c0_150 = arith.constant 0 : index
    %c0_151 = arith.constant 0 : index
    %400 = vector.load %arg15[%c1_149, %c0_150, %c0_151] : memref<2x1x64xf32, #tpu.memory_space<vmem>>, vector<1x1x64xf32>
    %401 = vector.shape_cast %400 : vector<1x1x64xf32> to vector<1x64xf32>
    %c1_152 = arith.constant 1 : index
    %c0_153 = arith.constant 0 : index
    %c0_154 = arith.constant 0 : index
    %402 = vector.load %arg16[%c1_152, %c0_153, %c0_154] : memref<2x1x64xf32, #tpu.memory_space<vmem>>, vector<1x1x64xf32>
    %403 = vector.shape_cast %402 : vector<1x1x64xf32> to vector<1x64xf32>
    %cst_155 = arith.constant dense<0.000000e+00> : vector<8xf32>
    %404 = vector.multi_reduction <add>, %399, %cst_155 [1] : vector<8x64xf32> to vector<8xf32>
    %405 = vector.shape_cast %404 : vector<8xf32> to vector<8x1xf32>
    %cst_156 = arith.constant 6.400000e+01 : f32
    %406 = vector.broadcast %cst_156 : f32 to vector<8x1xf32>
    %407 = arith.divf %405, %406 : vector<8x1xf32>
    %408 = vector.broadcast %407 : vector<8x1xf32> to vector<8x64xf32>
    %409 = arith.subf %399, %408 : vector<8x64xf32>
    %410 = vector.broadcast %407 : vector<8x1xf32> to vector<8x64xf32>
    %411 = arith.subf %399, %410 : vector<8x64xf32>
    %412 = arith.mulf %409, %411 : vector<8x64xf32>
    %cst_157 = arith.constant dense<0.000000e+00> : vector<8xf32>
    %413 = vector.multi_reduction <add>, %412, %cst_157 [1] : vector<8x64xf32> to vector<8xf32>
    %414 = vector.shape_cast %413 : vector<8xf32> to vector<8x1xf32>
    %cst_158 = arith.constant 6.400000e+01 : f32
    %415 = vector.broadcast %cst_158 : f32 to vector<8x1xf32>
    %416 = arith.divf %414, %415 : vector<8x1xf32>
    %417 = vector.broadcast %407 : vector<8x1xf32> to vector<8x64xf32>
    %418 = arith.subf %399, %417 : vector<8x64xf32>
    %cst_159 = arith.constant 9.99999996E-13 : f32
    %419 = vector.broadcast %cst_159 : f32 to vector<8x1xf32>
    %420 = arith.addf %416, %419 : vector<8x1xf32>
    %421 = math.rsqrt %420 : vector<8x1xf32>
    %422 = vector.broadcast %421 : vector<8x1xf32> to vector<8x64xf32>
    %423 = arith.mulf %418, %422 : vector<8x64xf32>
    %424 = vector.broadcast %401 : vector<1x64xf32> to vector<8x64xf32>
    %425 = arith.mulf %423, %424 : vector<8x64xf32>
    %426 = vector.broadcast %403 : vector<1x64xf32> to vector<8x64xf32>
    %427 = arith.addf %425, %426 : vector<8x64xf32>
    %428 = vector.extract_strided_slice %427 {offsets = [0, 0], sizes = [1, 64], strides = [1, 1]} : vector<8x64xf32> to vector<1x64xf32>
    %c0_160 = arith.constant 0 : index
    %c0_161 = arith.constant 0 : index
    %429 = vector.load %arg17[%c0_160, %c0_161] : memref<64x256xbf16, #tpu.memory_space<vmem>>, vector<64x256xbf16>
    %430 = arith.truncf %428 : vector<1x64xf32> to vector<1x64xbf16>
    %cst_162 = arith.constant dense<0.000000e+00> : vector<1x256xf32>
    %431 = tpu.matmul %430, %429, %cst_162 {dimension_numbers = #tpu.dot_dimension_numbers<[1], [0], [0], [1], [0, 0, 1, 1], [], []>} : vector<1x64xbf16>, vector<64x256xbf16>, vector<1x256xf32> -> vector<1x256xf32>
    %c0_163 = arith.constant 0 : index
    %c0_164 = arith.constant 0 : index
    %432 = vector.load %arg18[%c0_163, %c0_164] : memref<1x256xf32, #tpu.memory_space<vmem>>, vector<1x256xf32>
    %433 = arith.addf %431, %432 : vector<1x256xf32>
    %434 = arith.mulf %433, %433 : vector<1x256xf32>
    %435 = arith.mulf %433, %434 : vector<1x256xf32>
    %cst_165 = arith.constant 4.471500e-02 : f32
    %436 = vector.broadcast %cst_165 : f32 to vector<1x256xf32>
    %437 = arith.mulf %436, %435 : vector<1x256xf32>
    %438 = arith.addf %433, %437 : vector<1x256xf32>
    %cst_166 = arith.constant 0.797884583 : f32
    %439 = vector.broadcast %cst_166 : f32 to vector<1x256xf32>
    %440 = arith.mulf %439, %438 : vector<1x256xf32>
    %441 = math.tanh %440 : vector<1x256xf32>
    %cst_167 = arith.constant 1.000000e+00 : f32
    %442 = vector.broadcast %cst_167 : f32 to vector<1x256xf32>
    %443 = arith.addf %442, %441 : vector<1x256xf32>
    %cst_168 = arith.constant 5.000000e-01 : f32
    %444 = vector.broadcast %cst_168 : f32 to vector<1x256xf32>
    %445 = arith.mulf %444, %443 : vector<1x256xf32>
    %446 = arith.mulf %433, %445 : vector<1x256xf32>
    %c0_169 = arith.constant 0 : index
    %c0_170 = arith.constant 0 : index
    %447 = vector.load %arg19[%c0_169, %c0_170] : memref<256x32xbf16, #tpu.memory_space<vmem>>, vector<256x32xbf16>
    %448 = arith.truncf %446 : vector<1x256xf32> to vector<1x256xbf16>
    %cst_171 = arith.constant dense<0.000000e+00> : vector<1x32xf32>
    %449 = tpu.matmul %448, %447, %cst_171 {dimension_numbers = #tpu.dot_dimension_numbers<[1], [0], [0], [1], [0, 0, 1, 1], [], []>} : vector<1x256xbf16>, vector<256x32xbf16>, vector<1x32xf32> -> vector<1x32xf32>
    %c0_172 = arith.constant 0 : index
    %c0_173 = arith.constant 0 : index
    %450 = vector.load %arg20[%c0_172, %c0_173] : memref<1x32xf32, #tpu.memory_space<vmem>>, vector<1x32xf32>
    %451 = arith.addf %449, %450 : vector<1x32xf32>
    %452 = arith.mulf %451, %451 : vector<1x32xf32>
    %453 = arith.mulf %451, %452 : vector<1x32xf32>
    %cst_174 = arith.constant 4.471500e-02 : f32
    %454 = vector.broadcast %cst_174 : f32 to vector<1x32xf32>
    %455 = arith.mulf %454, %453 : vector<1x32xf32>
    %456 = arith.addf %451, %455 : vector<1x32xf32>
    %cst_175 = arith.constant 0.797884583 : f32
    %457 = vector.broadcast %cst_175 : f32 to vector<1x32xf32>
    %458 = arith.mulf %457, %456 : vector<1x32xf32>
    %459 = math.tanh %458 : vector<1x32xf32>
    %cst_176 = arith.constant 1.000000e+00 : f32
    %460 = vector.broadcast %cst_176 : f32 to vector<1x32xf32>
    %461 = arith.addf %460, %459 : vector<1x32xf32>
    %cst_177 = arith.constant 5.000000e-01 : f32
    %462 = vector.broadcast %cst_177 : f32 to vector<1x32xf32>
    %463 = arith.mulf %462, %461 : vector<1x32xf32>
    %464 = arith.mulf %451, %463 : vector<1x32xf32>
    %c0_178 = arith.constant 0 : index
    %c0_179 = arith.constant 0 : index
    %465 = vector.load %arg21[%c0_178, %c0_179] : memref<32x128xbf16, #tpu.memory_space<vmem>>, vector<32x128xbf16>
    %466 = arith.truncf %464 : vector<1x32xf32> to vector<1x32xbf16>
    %cst_180 = arith.constant dense<0.000000e+00> : vector<1x128xf32>
    %467 = tpu.matmul %466, %465, %cst_180 {dimension_numbers = #tpu.dot_dimension_numbers<[1], [0], [0], [1], [0, 0, 1, 1], [], []>} : vector<1x32xbf16>, vector<32x128xbf16>, vector<1x128xf32> -> vector<1x128xf32>
    %c0_181 = arith.constant 0 : index
    %c0_182 = arith.constant 0 : index
    %468 = vector.load %arg22[%c0_181, %c0_182] : memref<1x128xf32, #tpu.memory_space<vmem>>, vector<1x128xf32>
    %469 = arith.addf %467, %468 : vector<1x128xf32>
    %470 = arith.negf %469 : vector<1x128xf32>
    %471 = math.exp %470 : vector<1x128xf32>
    %cst_183 = arith.constant 1.000000e+00 : f32
    %472 = vector.broadcast %cst_183 : f32 to vector<1x128xf32>
    %473 = arith.addf %472, %471 : vector<1x128xf32>
    %474 = arith.divf %472, %473 : vector<1x128xf32>
    %c0_184 = arith.constant 0 : index
    %c0_185 = arith.constant 0 : index
    %c0_186 = arith.constant 0 : index
    %475 = vector.load %arg23[%c0_184, %c0_185, %c0_186] : memref<1x1x128xf32, #tpu.memory_space<vmem>>, vector<1x1x128xf32>
    %476 = vector.shape_cast %475 : vector<1x1x128xf32> to vector<1x128xf32>
    %477 = vector.shape_cast %474 : vector<1x128xf32> to vector<1x1x128xf32>
    tpu.vector_store %arg23[%c0_184, %c0_185, %c0_186], %477 {strides = array<i32>} : memref<1x1x128xf32, #tpu.memory_space<vmem>>, vector<1x1x128xf32>,
    return
  }
  func.func @transform_0(%arg0: i32) -> (i32, i32, i32) {
    %c0_i32 = arith.constant 0 : i32
    %c0_i32_0 = arith.constant 0 : i32
    %c0_i32_1 = arith.constant 0 : i32
    return %arg0, %c0_i32, %c0_i32_0 : i32, i32, i32
  }
  func.func @transform_1(%arg0: i32) -> (i32, i32, i32) {
    %c0_i32 = arith.constant 0 : i32
    %c0_i32_0 = arith.constant 0 : i32
    %c0_i32_1 = arith.constant 0 : i32
    return %arg0, %c0_i32, %c0_i32_0 : i32, i32, i32
  }
  func.func @transform_2(%arg0: i32) -> (i32, i32) {
    %c0_i32 = arith.constant 0 : i32
    %c0_i32_0 = arith.constant 0 : i32
    %c0_i32_1 = arith.constant 0 : i32
    return %c0_i32, %c0_i32_0 : i32, i32
  }
  func.func @transform_3(%arg0: i32) -> (i32, i32) {
    %c0_i32 = arith.constant 0 : i32
    %c0_i32_0 = arith.constant 0 : i32
    %c0_i32_1 = arith.constant 0 : i32
    return %c0_i32, %c0_i32_0 : i32, i32
  }
  func.func @transform_4(%arg0: i32) -> (i32, i32, i32) {
    %c0_i32 = arith.constant 0 : i32
    %c0_i32_0 = arith.constant 0 : i32
    %c0_i32_1 = arith.constant 0 : i32
    %c0_i32_2 = arith.constant 0 : i32
    return %c0_i32, %c0_i32_0, %c0_i32_1 : i32, i32, i32
  }
  func.func @transform_5(%arg0: i32) -> (i32, i32, i32) {
    %c0_i32 = arith.constant 0 : i32
    %c0_i32_0 = arith.constant 0 : i32
    %c0_i32_1 = arith.constant 0 : i32
    %c0_i32_2 = arith.constant 0 : i32
    return %c0_i32, %c0_i32_0, %c0_i32_1 : i32, i32, i32
  }
  func.func @transform_6(%arg0: i32) -> (i32, i32, i32) {
    %c0_i32 = arith.constant 0 : i32
    %c0_i32_0 = arith.constant 0 : i32
    %c0_i32_1 = arith.constant 0 : i32
    %c0_i32_2 = arith.constant 0 : i32
    return %c0_i32, %c0_i32_0, %c0_i32_1 : i32, i32, i32
  }
  func.func @transform_7(%arg0: i32) -> (i32, i32, i32) {
    %c0_i32 = arith.constant 0 : i32
    %c0_i32_0 = arith.constant 0 : i32
    %c0_i32_1 = arith.constant 0 : i32
    %c0_i32_2 = arith.constant 0 : i32
    return %c0_i32, %c0_i32_0, %c0_i32_1 : i32, i32, i32
  }
  func.func @transform_8(%arg0: i32) -> (i32, i32, i32) {
    %c0_i32 = arith.constant 0 : i32
    %c0_i32_0 = arith.constant 0 : i32
    %c0_i32_1 = arith.constant 0 : i32
    %c0_i32_2 = arith.constant 0 : i32
    return %c0_i32, %c0_i32_0, %c0_i32_1 : i32, i32, i32
  }
  func.func @transform_9(%arg0: i32) -> (i32, i32, i32) {
    %c0_i32 = arith.constant 0 : i32
    %c0_i32_0 = arith.constant 0 : i32
    %c0_i32_1 = arith.constant 0 : i32
    %c0_i32_2 = arith.constant 0 : i32
    return %c0_i32, %c0_i32_0, %c0_i32_1 : i32, i32, i32
  }
  func.func @transform_10(%arg0: i32) -> (i32, i32, i32) {
    %c0_i32 = arith.constant 0 : i32
    %c0_i32_0 = arith.constant 0 : i32
    %c0_i32_1 = arith.constant 0 : i32
    %c0_i32_2 = arith.constant 0 : i32
    return %c0_i32, %c0_i32_0, %c0_i32_1 : i32, i32, i32
  }
  func.func @transform_11(%arg0: i32) -> (i32, i32, i32) {
    %c0_i32 = arith.constant 0 : i32
    %c0_i32_0 = arith.constant 0 : i32
    %c0_i32_1 = arith.constant 0 : i32
    %c0_i32_2 = arith.constant 0 : i32
    return %c0_i32, %c0_i32_0, %c0_i32_1 : i32, i32, i32
  }
  func.func @transform_12(%arg0: i32) -> (i32, i32, i32) {
    %c0_i32 = arith.constant 0 : i32
    %c0_i32_0 = arith.constant 0 : i32
    %c0_i32_1 = arith.constant 0 : i32
    %c0_i32_2 = arith.constant 0 : i32
    return %c0_i32, %c0_i32_0, %c0_i32_1 : i32, i32, i32
  }
  func.func @transform_13(%arg0: i32) -> (i32, i32, i32) {
    %c0_i32 = arith.constant 0 : i32
    %c0_i32_0 = arith.constant 0 : i32
    %c0_i32_1 = arith.constant 0 : i32
    %c0_i32_2 = arith.constant 0 : i32
    return %c0_i32, %c0_i32_0, %c0_i32_1 : i32, i32, i32
  }
  func.func @transform_14(%arg0: i32) -> (i32, i32, i32) {
    %c0_i32 = arith.constant 0 : i32
    %c0_i32_0 = arith.constant 0 : i32
    %c0_i32_1 = arith.constant 0 : i32
    %c0_i32_2 = arith.constant 0 : i32
    return %c0_i32, %c0_i32_0, %c0_i32_1 : i32, i32, i32
  }
  func.func @transform_15(%arg0: i32) -> (i32, i32, i32) {
    %c0_i32 = arith.constant 0 : i32
    %c0_i32_0 = arith.constant 0 : i32
    %c0_i32_1 = arith.constant 0 : i32
    %c0_i32_2 = arith.constant 0 : i32
    return %c0_i32, %c0_i32_0, %c0_i32_1 : i32, i32, i32
  }
  func.func @transform_16(%arg0: i32) -> (i32, i32) {
    %c0_i32 = arith.constant 0 : i32
    %c0_i32_0 = arith.constant 0 : i32
    %c0_i32_1 = arith.constant 0 : i32
    return %c0_i32, %c0_i32_0 : i32, i32
  }
  func.func @transform_17(%arg0: i32) -> (i32, i32) {
    %c0_i32 = arith.constant 0 : i32
    %c0_i32_0 = arith.constant 0 : i32
    %c0_i32_1 = arith.constant 0 : i32
    return %c0_i32, %c0_i32_0 : i32, i32
  }
  func.func @transform_18(%arg0: i32) -> (i32, i32) {
    %c0_i32 = arith.constant 0 : i32
    %c0_i32_0 = arith.constant 0 : i32
    %c0_i32_1 = arith.constant 0 : i32
    return %c0_i32, %c0_i32_0 : i32, i32
  }
  func.func @transform_19(%arg0: i32) -> (i32, i32) {
    %c0_i32 = arith.constant 0 : i32
    %c0_i32_0 = arith.constant 0 : i32
    %c0_i32_1 = arith.constant 0 : i32
    return %c0_i32, %c0_i32_0 : i32, i32
  }
  func.func @transform_20(%arg0: i32) -> (i32, i32) {
    %c0_i32 = arith.constant 0 : i32
    %c0_i32_0 = arith.constant 0 : i32
    %c0_i32_1 = arith.constant 0 : i32
    return %c0_i32, %c0_i32_0 : i32, i32
  }
  func.func @transform_21(%arg0: i32) -> (i32, i32) {
    %c0_i32 = arith.constant 0 : i32
    %c0_i32_0 = arith.constant 0 : i32
    %c0_i32_1 = arith.constant 0 : i32
    return %c0_i32, %c0_i32_0 : i32, i32
  }
  func.func @transform_22(%arg0: i32) -> (i32, i32, i32) {
    %c0_i32 = arith.constant 0 : i32
    %c0_i32_0 = arith.constant 0 : i32
    %c0_i32_1 = arith.constant 0 : i32
    return %arg0, %c0_i32, %c0_i32_0 : i32, i32, i32
  }
}

</mosaic_0001>

<bundles_post_ra>
// kernel: bert_classification_ml_forward.1
= control target key start
LH: loop header
LB: loop body
LE: loop exit
PB: predicated region body
PF: predicated region fallthrough
CT: control target
= control target key end

     0   :  { %s4306_s0 = inlined_call_operand.vmem [shape: f32[2,8,64], index: 0, kind: input, shape index: {}]   ;;  %s4307_s1 = inlined_call_operand.vmem [shape: f32[2,1,8], index: 1, kind: input, shape index: {}]   ;;  %s4308_s2 = inlined_call_operand.vmem [shape: f32[1,64], index: 2, kind: input, shape index: {}]   ;;  %s4309_s3 = inlined_call_operand.vmem [shape: f32[1,64], index: 3, kind: input, shape index: {}]   ;;  %s4310_s4 = inlined_call_operand.vmem [shape: bf16[2,64,192], index: 4, kind: input, shape index: {}]   ;;  %s4311_s5 = inlined_call_operand.vmem [shape: f32[2,1,192], index: 5, kind: input, shape index: {}]   ;;  %s4312_s6 = inlined_call_operand.vmem [shape: bf16[2,64,64], index: 6, kind: input, shape index: {}]   ;;  %s4313_s7 = inlined_call_operand.vmem [shape: f32[2,1,64], index: 7, kind: input, shape index: {}]   ;;  %s4314_s8 = inlined_call_operand.vmem [shape: f32[2,1,64], index: 8, kind: input, shape index: {}]   ;;  %s4315_s9 = inlined_call_operand.vmem [shape: f32[2,1,64], index: 9, kind: input, shape index: {}]   ;;  %s4316_s10 = inlined_call_operand.vmem [shape: bf16[2,64,128], index: 10, kind: input, shape index: {}]   ;;  %s4317_s11 = inlined_call_operand.vmem [shape: f32[2,1,128], index: 11, kind: input, shape index: {}]   ;;  %s4318_s12 = inlined_call_operand.vmem [shape: bf16[2,128,64], index: 12, kind: input, shape index: {}]   ;;  %s4319_s13 = inlined_call_operand.vmem [shape: f32[2,1,64], index: 13, kind: input, shape index: {}]   ;;  %s4320_s14 = inlined_call_operand.vmem [shape: f32[2,1,64], index: 14, kind: input, shape index: {}]   ;;  %s4321_s15 = inlined_call_operand.vmem [shape: f32[2,1,64], index: 15, kind: input, shape index: {}]   ;;  %s4322_s16 = inlined_call_operand.vmem [shape: bf16[64,256], index: 16, kind: input, shape index: {}]   ;;  %s4323_s17 = inlined_call_operand.vmem [shape: f32[1,256], index: 17, kind: input, shape index: {}]   ;;  %s4324_s18 = inlined_call_operand.vmem [shape: bf16[256,32], index: 18, kind: input, shape index: {}]   ;;  %s4325_s19 = inlined_call_operand.vmem [shape: f32[1,32], index: 19, kind: input, shape index: {}]   ;;  %s4326_s20 = inlined_call_operand.vmem [shape: bf16[32,128], index: 20, kind: input, shape index: {}]   ;;  %s4327_s21 = inlined_call_operand.vmem [shape: f32[1,128], index: 21, kind: input, shape index: {}]   ;;  %s4328_s22 = inlined_call_operand.vmem [shape: f32[2,1,128], index: 22, kind: output, shape index: {}]  }
   0x1   :  { %4345 = sst [smem:[#allocation2_spill]] %s4306_s0 }
   0x2   :  { %4346 = sst [smem:[#allocation3_spill]] %s4307_s1 }
   0x3   :  { %4347 = sst [smem:[#allocation4_spill]] %s4308_s2 }
   0x4   :  { %4348 = sst [smem:[#allocation5_spill]] %s4309_s3  ;;  %s3757_s3 = smov 0  }
   0x5   :  { %4349 = sst [smem:[#allocation6_spill]] %s4310_s4 }
   0x6   :  { %4350 = sst [smem:[#allocation7_spill]] %s4311_s5 }
   0x7   :  { %4351 = sst [smem:[#allocation8_spill]] %s4312_s6 }
   0x8 LB: > { %s3005_s28 = sadd.s32 4294967295, %s3630_s3   ;;  %p3009_p0 = scmp.ge.s32.totalorder %s3630_s3, 1  ;;  %s3630_s3 = sphi %s3757_s3, %s32_s3  }
   0x9   : > { %p619_p1 = scmp.lt.s32.totalorder %s3630_s3, 3 }
   0xb   : > { %p620_p2 = pnand %p3009_p0, %p619_p1 }
   0xc   : > { %p681_p3 = scmp.lt.s32.totalorder (!%p620_p2), %s3005_s28, 1  ;;  %s4352_s0 = sld [smem:[#allocation2_spill]] (!%p620_p2) }
   0xd   : > { %623 = sbr.rel (%p620_p2) target bundleno = 5902 (0x170e), region = 108  ;;  %s4353_s24 = sld [smem:[#allocation6_spill]] (!%p620_p2) }
   0xe   : > { %s4354_s27 = sld [smem:[#allocation4_spill]] (!%p620_p2)  ;;  %s4334_s5 = smov (!%p620_p2), 112  }
   0xf   : > { %s4355_s4 = sld [smem:[#allocation5_spill]] (!%p620_p2)  ;;  %s4342_s6 = smov (!%p620_p2), 64  }
  0x10   : > { %s4356_s1 = sld [smem:[#allocation7_spill]] (!%p620_p2)  ;;  %s4343_s25 = smov (!%p620_p2), 48  }
  0x11   : > { %s4340_s26 = smov (!%p620_p2), 32   ;;  %s4336_s2 = smov (!%p620_p2), 96  }
  0x12   : > { %s4367_s28 = smov (!%p681_p3, %s3005_s28), 1  ;;  %vm696_vm0 = vcmask 523264   ;;  %v3632_v11 = vmov 0   ;;  %v736_v26 = vlaneseq  ;;  %v3633_v28 = vmov 0.0   ;;  %s4359_s30 = smov 48  }
  0x13   : > { %s3010_s29 = sshll.u32 %s4367_s28, 3  ;;  %v3482_v7 = vld [vmem:[%s4353_s24 + $0x34] ss:$8 sps:$4 sm:$0xff]   ;;  %v3484_v8 = vld [vmem:[%s4353_s24 + $0x30] ss:$8 sps:$4 sm:$0xff]   ;;  %821 = vmatprep.mubr.bf16.mxu0 %v3632_v11  ;;  %3272 = vmatprep.subr.bf16.mxu1 %v3633_v28  ;;  %vm3634_vm1 = vmmov 0  }
  0x14   : > { %s684_s23 = scalar_lea.vmem %s4352_s0, %s3010_s29  ;;  %v3485_v9 = vld [vmem:[%s4353_s24 + $0x24] ss:$8 sps:$4 sm:$0xff]   ;;  %797 = vmatprep.subr.bf16.mxu0 %v3482_v7  ;;  %v3487_v10 = vld [vmem:[%s4353_s24 + $0x20] ss:$8 sps:$4 sm:$0xff]   ;;  %v3488_v12 = vld [vmem:[%s4353_s24 + $0x14] ss:$8 sps:$4 sm:$0xff]   ;;  %3274 = vmatprep.mubr.msk.bf16.mxu1 %vm3634_vm1, %v3633_v28 }
  0x15   : > { %v692_v0 = vld [vmem:[%s684_s23] sm:$0xff]  ;;  %798 = vmatpush1.bf16.msra.mxu0 %v3484_v8  ;;  %v3490_v13 = vld [vmem:[%s4353_s24 + $0x10] ss:$8 sps:$4 sm:$0xff]   ;;  %v737_v27 = vshrl.u32 %v736_v26, 7  ;;  %s4332_s29 = smov 80   ;;  %vm835_vm2 = vcmask 130048  }
  0x16   : > { %v697_v1 = vsel %vm696_vm0, %v692_v0, 0.0  ;;  %799 = vmatprep.subr.bf16.mxu0 %v3485_v9  ;;  %v3491_v14 = vld [vmem:[%s4353_s24 + $0x4] ss:$8 sps:$4 sm:$0xff]   ;;  %v3493_v15 = vld [vmem:[%s4353_s24] ss:$8 sps:$4 sm:$0xff]   ;;  %vm906_vm3 = vcmask 1043456  }
  0x17   : > { %698 = vadd.xlane.f32.xlu0 %v697_v1  ;;  %v3011_v20 = vld [vmem:[%s4354_s27] ss:$0 sm:$0xff]  ;;  %v3811_v29 = vsub.s32 0, %v737_v27  ;;  %s4338_s27 = smov 16   ;;  %v3828_v38 = vsub.s32 1, %v737_v27  ;;  %s4357_s0 = sld [smem:[#allocation3_spill]] }
  0x18   : > { %v3012_v22 = vld [vmem:[%s4355_s4] ss:$0 sm:$0xff]  ;;  %vm890_vm4 = vcmask 64512   ;;  %vm1300_vm5 = vcmask 261120   ;;  %vm1302_vm6 = vcmask 392192   ;;  %s4360_s4 = smov 64  }
  0x19   : > { %800 = vmatpush1.bf16.msra.mxu0 %v3487_v10  ;;  %v734_v30 = vld [vmem:[%s4356_s1] sm:$0x3] }
  0x1a   : > { %801 = vmatprep.subr.bf16.mxu0 %v3488_v12  ;;  %v739_v31 = vrot.slane %v734_v30, %v3811_v29  ;;  %v743_v39 = vrot.slane %v734_v30, %v3828_v38 }
  0x1d   : > { %802 = vmatpush1.bf16.msra.mxu0 %v3490_v13  ;;  %s687_s23 = scalar_lea.vmem %s4357_s0, %s4367_s28  ;;  %s4358_s0 = sld [smem:[#allocation8_spill]] }
  0x1e   : > { %803 = vmatprep.subr.bf16.mxu0 %v3491_v14  ;;  %v3860_v54 = vld [vmem:[%s687_s23] ss:$0 sm:$0xff] }
  0x21   : > { %804 = vmatpush1.bf16.msra.mxu0 %v3493_v15 }
  0x22   : > { %3284 = vmatprep.subr.bf16.mxu0 %v3633_v28 }
  0xa0   : > { %v699_v2 = vpop.xlane.xlu0 %698 }
  0xa1   : > { %v701_v3 = vmul.f32 0.015625, %v699_v2 }
  0xa3   : > { %v702_v4 = vsub.f32 %v692_v0, %v701_v3 }
  0xa5   : > { %v703_v5 = vmul.f32 %v702_v4, %v702_v4 }
  0xa7   : > { %v704_v6 = vsel %vm696_vm0, %v703_v5, 0.0 }
  0xa8   : > { %705 = vadd.xlane.f32.xlu0 %v704_v6 }
 0x131   : > { %v706_v16 = vpop.xlane.xlu0 %705 }
 0x132   : > { %v707_v17 = vmul.f32 0.015625, %v706_v16 }
 0x134   : > { %v708_v18 = vadd.f32 1e-12, %v707_v17 }
 0x136   : > { %3568 = vrsqrt.f32 %v708_v18 }
 0x143   : > { %v3569_v19 = vpop.eup %3568 }
 0x144   : > { %v710_v21 = vmul.f32 %v3569_v19, %v702_v4 }
 0x146   : > { %v717_v23 = vmul.f32 %v3011_v20, %v710_v21 }
 0x148   : > { %v3804_v24 = vadd.f32 %v3012_v22, %v717_v23 }
 0x14a   : > { %v733_v25 = vpack.c.bf16 %v3804_v24, %v3804_v24 }
 0x14c   : > { %3021 = vmatmul.mubr.msk.bf16.vlgmr.msra.gmra.mxu0 %vm696_vm0, %v733_v25 }
 0x14d   : > { %3286 = vmatprep.mubr.msk.bf16.mxu0 %vm3634_vm1, %v3633_v28 }
 0x20c   : > { %v823_v32 = vpop.f32.mrf.mxu0 }
 0x20d   : > { %v824_v33 = vadd.f32 %v823_v32, %v739_v31 }
 0x20e   : > { %v825_v34 = vpop.f32.mrf.mxu0 }
 0x20f   : > { %v830_v35 = vpack.c.bf16 %v824_v33, %v824_v33  ;;  %v826_v41 = vadd.f32 %v825_v34, %v743_v39 }
 0x210   : > { %v827_v36 = vpop.f32.mrf.mxu0 }
 0x211   : > { %950 = vrot.lane.b32.xlu0 %v830_v35, %s4334_s5  ;;  %833 = vrot.lane.b32.xlu1 %v830_v35, %s4342_s6  ;;  %v3833_v44 = vpack.c.bf16 %v826_v41, %v826_v41  ;;  %s4363_s6 = smov 80  }
 0x212   : > { %v828_v37 = vpop.f32.mrf.mxu0 }
 0x213   : > { %v908_v47 = vsel %vm906_vm3, %v3833_v44, 0 }
 0x215   : > { %952 = vrot.lane.b32.xlu1 %v830_v35, %s4343_s25 }
 0x219   : > { %1065 = vrot.lane.b32.xlu1 %v830_v35, %s4340_s26 }
 0x21d   : > { %1063 = vrot.lane.b32.xlu1 %v830_v35, %s4336_s2 }
 0x221   : > { %1177 = vrot.lane.b32.xlu1 %v830_v35, %s4338_s27 }
 0x225   : > { %1175 = vrot.lane.b32.xlu1 %v830_v35, %s4332_s29 }
 0x283   : > { %v834_v40 = vpop.permute.xlu1 %833  ;;  %v951_v48 = vpop.permute.xlu0 %950 }
 0x284   : > { %v840_v42 = vsel %vm835_vm2, %v834_v40, 0 }
 0x285   : > { %3273 = vmatpush3.bf16.xpose.msra.mxu1 %v840_v42 }
 0x286   : > { %3278 = vmatprep.subr.bf16.mxu1 %v3633_v28 }
 0x287   : > { %v953_v43 = vpop.permute.xlu1 %952 }
 0x288   : > { %v958_v45 = vsel %vm835_vm2, %v953_v43, 0 }
 0x289   : > { %3285 = vmatpush3.bf16.xpose.msra.mxu0 %v958_v45 }
 0x28a   : > { %3296 = vmatprep.subr.bf16.mxu0 %v3633_v28 }
 0x28b   : > { %v1066_v46 = vpop.permute.xlu1 %1065 }
 0x28c   : > { %3275 = vmatmul.mubr.msk.bf16.vlgmr.msra.gmra.mxu1 %vm835_vm2, %v830_v35  ;;  %v1071_v50 = vsel %vm835_vm2, %v1066_v46, 0 }
 0x28d   : > { %3279 = vmatpush3.bf16.msra.mxu1 %v908_v47  ;;  %3280 = vmatprep.mubr.msk.bf16.mxu1 %vm3634_vm1, %v3633_v28 }
 0x28e   : > { %3290 = vmatprep.subr.bf16.mxu1 %v3633_v28 }
 0x28f   : > { %v1064_v49 = vpop.permute.xlu1 %1063 }
 0x290   : > { %3287 = vmatmul.mubr.msk.bf16.vlgmr.msra.gmra.mxu0 %vm835_vm2, %v951_v48 }
 0x291   : > { %3297 = vmatpush3.bf16.xpose.msra.mxu0 %v1071_v50  ;;  %3298 = vmatprep.mubr.msk.bf16.mxu0 %vm3634_vm1, %v3633_v28 }
 0x292   : > { %3308 = vmatprep.subr.bf16.mxu0 %v3633_v28 }
 0x293   : > { %v1178_v51 = vpop.permute.xlu1 %1177 }
 0x294   : > { %v1183_v52 = vsel %vm835_vm2, %v1178_v51, 0 }
 0x297   : > { %v1176_v53 = vpop.permute.xlu1 %1175 }
 0x298   : > { %3299 = vmatmul.mubr.msk.bf16.vlgmr.msra.gmra.mxu0 %vm835_vm2, %v1064_v49 }
 0x299   : > { %3309 = vmatpush3.bf16.xpose.msra.mxu0 %v1183_v52  ;;  %3310 = vmatprep.mubr.msk.bf16.mxu0 %vm3634_vm1, %v3633_v28 }
 0x29a   : > { %3320 = vmatprep.subr.bf16.mxu0 %v3633_v28 }
 0x2a0   : > { %3311 = vmatmul.mubr.msk.bf16.vlgmr.msra.gmra.mxu0 %vm835_vm2, %v1176_v53 }
 0x2a1   : > { %3328 = vmatprep.mubr.msk.bf16.mxu0 %vm3634_vm1, %v3633_v28 }
 0x34c   : > { %v876_v55 = vpop.f32.mrf.mxu1 }
 0x34d   : > { %v882_v56 = vmul.f32 0.25, %v876_v55 }
 0x34e   : > { %v3276_v57 = vpop.f32.mrf.mxu1 }
 0x34f   : > { %v889_v58 = vadd.f32 %v3860_v54, %v882_v56 }
 0x350   : > { %v879_v59 = vpop.f32.mrf.mxu1  ;;  %v994_v60 = vpop.f32.mrf.mxu0 }
 0x351   : > { %v1000_v61 = vmul.f32 0.25, %v994_v60  ;;  %v891_v62 = vsel %vm890_vm4, %v889_v58, -inf }
 0x352   : > { %892 = vmax.xlane.f32.xlu1 %v891_v62  ;;  %v3277_v63 = vpop.f32.mrf.mxu1  ;;  %v3288_v0 = vpop.f32.mrf.mxu0 }
 0x353   : > { %v1001_v1 = vadd.f32 %v3860_v54, %v1000_v61 }
 0x354   : > { %v997_v2 = vpop.f32.mrf.mxu0 }
 0x355   : > { %v1002_v3 = vsel %vm890_vm4, %v1001_v1, -inf }
 0x356   : > { %1003 = vmax.xlane.f32.xlu0 %v1002_v3  ;;  %v3289_v4 = vpop.f32.mrf.mxu0  ;;  %v3494_v3 = vld [vmem:[%s4358_s0 + $0x18] sm:$0xff]  }
 0x357   : > { %3321 = vmatpush3.bf16.msra.mxu0 %v3494_v3  ;;  %v3507_v3 = vld [vmem:[%s4318_s12 + $0x10] sm:$0xff]  }
 0x358   : > { %v1107_v5 = vpop.f32.mrf.mxu0  ;;  %3322 = vmatprep.subr.bf16.mxu0 %v3633_v28 }
 0x359   : > { %v1113_v6 = vmul.f32 0.25, %v1107_v5 }
 0x35a   : > { %v3300_v7 = vpop.f32.mrf.mxu0 }
 0x35b   : > { %v1114_v8 = vadd.f32 %v3860_v54, %v1113_v6 }
 0x35c   : > { %v1110_v9 = vpop.f32.mrf.mxu0 }
 0x35d   : > { %v1115_v10 = vsel %vm890_vm4, %v1114_v8, -inf }
 0x35e   : > { %1116 = vmax.xlane.f32.xlu1 %v1115_v10  ;;  %v3301_v12 = vpop.f32.mrf.mxu0 }
 0x360   : > { %v1219_v13 = vpop.f32.mrf.mxu0 }
 0x361   : > { %v1225_v14 = vmul.f32 0.25, %v1219_v13  ;;  %v3495_v13 = vld [vmem:[%s4358_s0 + $0x10] sm:$0xff]  }
 0x362   : > { %v3312_v15 = vpop.f32.mrf.mxu0  ;;  %3323 = vmatpush3.bf16.msra.mxu0 %v3495_v13 }
 0x363   : > { %v1226_v16 = vadd.f32 %v3860_v54, %v1225_v14  ;;  %v3496_v14 = vld [vmem:[%s4358_s0 + $0x8] sm:$0xff]   ;;  %3324 = vmatprep.subr.bf16.mxu0 %v3633_v28  ;;  %v3497_v15 = vld [vmem:[%s4358_s0] sm:$0xff]  }
 0x364   : > { %v1222_v17 = vpop.f32.mrf.mxu0 }
 0x365   : > { %v1227_v18 = vsel %vm890_vm4, %v1226_v16, -inf }
 0x366   : > { %1228 = vmax.xlane.f32.xlu0 %v1227_v18  ;;  %v3313_v19 = vpop.f32.mrf.mxu0  ;;  %3325 = vmatpush3.bf16.msra.mxu0 %v3496_v14 }
 0x367   : > { %3326 = vmatprep.subr.bf16.mxu0 %v3633_v28 }
 0x36a   : > { %3327 = vmatpush3.bf16.msra.mxu0 %v3497_v15 }
 0x36b   : > { %3344 = vmatprep.subr.bf16.mxu0 %v3633_v28 }
 0x3db   : > { %v893_v20 = vpop.xlane.xlu1 %892 }
 0x3dc   : > { %v894_v21 = vsub.f32 %v889_v58, %v893_v20 }
 0x3de   : > { %v895_v22 = vmul.f32 1.442695, %v894_v21 }
 0x3df   : > { %v1004_v23 = vpop.xlane.xlu0 %1003 }
 0x3e0   : > { %3570 = vpow2.f32 %v895_v22  ;;  %v1005_v25 = vsub.f32 %v1001_v1, %v1004_v23 }
 0x3e2   : > { %v1006_v26 = vmul.f32 1.442695, %v1005_v25 }
 0x3e4   : > { %3572 = vpow2.f32 %v1006_v26 }
 0x3e7   : > { %v1117_v39 = vpop.xlane.xlu1 %1116 }
 0x3e8   : > { %v1118_v40 = vsub.f32 %v1114_v8, %v1117_v39 }
 0x3ea   : > { %v1119_v41 = vmul.f32 1.442695, %v1118_v40 }
 0x3ed   : > { %v3571_v27 = vpop.eup %3570 }
 0x3ee   : > { %v897_v30 = vsel %vm890_vm4, %v3571_v27, 0.0 }
 0x3ef   : > { %v1229_v31 = vpop.xlane.xlu0 %1228  ;;  %898 = vadd.xlane.f32.xlu1 %v897_v30 }
 0x3f0   : > { %v1230_v32 = vsub.f32 %v1226_v16, %v1229_v31 }
 0x3f1   : > { %v3573_v33 = vpop.eup %3572 }
 0x3f2   : > { %v1231_v34 = vmul.f32 1.442695, %v1230_v32  ;;  %v1008_v35 = vsel %vm890_vm4, %v3573_v33, 0.0 }
 0x3f3   : > { %1009 = vadd.xlane.f32.xlu0 %v1008_v35 }
 0x3f4   : > { %3574 = vpow2.f32 %v1231_v34  ;;  %v3031_v34 = vld [vmem:[%s4313_s7] ss:$0 sm:$0xff] }
 0x3f5   : > { %3576 = vpow2.f32 %v1119_v41 }
 0x400   : > { %1015 = vrot.lane.b32.xlu1 %v3833_v44, %s4334_s5  ;;  %s4365_s5 = smov 16  }
 0x401   : > { %v3575_v36 = vpop.eup %3574 }
 0x402   : > { %v1233_v37 = vsel %vm890_vm4, %v3575_v36, 0.0  ;;  %v3577_v42 = vpop.eup %3576 }
 0x403   : > { %1234 = vadd.xlane.f32.xlu0 %v1233_v37  ;;  %v1121_v43 = vsel %vm890_vm4, %v3577_v42, 0.0 }
 0x419   : > { %1127 = vrot.lane.b32.xlu0 %v3833_v44, %s4336_s2 }
 0x424   : > { %1122 = vadd.xlane.f32.xlu1 %v1121_v43 }
 0x435   : > { %1239 = vrot.lane.b32.xlu1 %v3833_v44, %s4332_s29 }
 0x478   : > { %v899_v45 = vpop.xlane.xlu1 %898 }
 0x479   : > { %3578 = vrcp.f32 %v899_v45 }
 0x47c   : > { %v1010_v46 = vpop.xlane.xlu0 %1009  ;;  %v1016_v49 = vpop.permute.xlu1 %1015 }
 0x47d   : > { %3580 = vrcp.f32 %v1010_v46  ;;  %v1021_v52 = vsel %vm906_vm3, %v1016_v49, 0  ;;  %v3498_v49 = vld [vmem:[%s4316_s10 + $0x18] sm:$0xff]  }
 0x486   : > { %v3579_v47 = vpop.eup %3578 }
 0x487   : > { %v901_v48 = vmul.f32 %v3579_v47, %v3571_v27 }
 0x489   : > { %v902_v50 = vpack.c.bf16 %v901_v48, %v901_v48 }
 0x48a   : > { %v3581_v51 = vpop.eup %3580 }
 0x48b   : > { %3281 = vmatmul.mubr.msk.bf16.vlgmr.msra.gmra.mxu1 %vm890_vm4, %v902_v50  ;;  %v1012_v44 = vmul.f32 %v3581_v51, %v3573_v33  ;;  %v3500_v50 = vld [vmem:[%s4316_s10 + $0x8] sm:$0xff]   ;;  %v3501_v51 = vld [vmem:[%s4316_s10] sm:$0xff]  }
 0x48c   : > { %3291 = vmatpush3.bf16.msra.mxu1 %v1021_v52  ;;  %v1235_v53 = vpop.xlane.xlu0 %1234  ;;  %3292 = vmatprep.mubr.msk.bf16.mxu1 %vm3634_vm1, %v3633_v28 }
 0x48d   : > { %3302 = vmatprep.subr.bf16.mxu1 %v3633_v28  ;;  %v1013_v57 = vpack.c.bf16 %v1012_v44, %v1012_v44 }
 0x490   : > { %v1128_v55 = vpop.permute.xlu0 %1127 }
 0x491   : > { %v1133_v56 = vsel %vm906_vm3, %v1128_v55, 0 }
 0x493   : > { %3293 = vmatmul.mubr.msk.bf16.vlgmr.msra.gmra.mxu1 %vm890_vm4, %v1013_v57 }
 0x494   : > { %3303 = vmatpush3.bf16.msra.mxu1 %v1133_v56  ;;  %3304 = vmatprep.mubr.msk.bf16.mxu1 %vm3634_vm1, %v3633_v28  ;;  %v3037_v56 = vld [vmem:[%s4314_s8] ss:$0 sm:$0xff] }
 0x495   : > { %3314 = vmatprep.subr.bf16.mxu1 %v3633_v28 }
 0x4ad   : > { %v1123_v58 = vpop.xlane.xlu1 %1122 }
 0x4ae   : > { %3582 = vrcp.f32 %v1123_v58  ;;  %v3038_v58 = vld [vmem:[%s4315_s9] ss:$0 sm:$0xff] }
 0x4af   : > { %3584 = vrcp.f32 %v1235_v53 }
 0x4b1   : > { %v1240_v61 = vpop.permute.xlu1 %1239 }
 0x4b2   : > { %v1245_v0 = vsel %vm906_vm3, %v1240_v61, 0 }
 0x4bb   : > { %v3583_v59 = vpop.eup %3582 }
 0x4bc   : > { %v1125_v60 = vmul.f32 %v3583_v59, %v3577_v42  ;;  %v3585_v63 = vpop.eup %3584 }
 0x4bd   : > { %v1237_v1 = vmul.f32 %v3585_v63, %v3575_v36  ;;  %v3503_v63 = vld [vmem:[%s4318_s12 + $0x30] sm:$0xff]  }
 0x4be   : > { %v1126_v62 = vpack.c.bf16 %v1125_v60, %v1125_v60 }
 0x4bf   : > { %v1238_v2 = vpack.c.bf16 %v1237_v1, %v1237_v1  ;;  %v3505_v1 = vld [vmem:[%s4318_s12 + $0x20] sm:$0xff]  }
 0x4c0   : > { %3305 = vmatmul.mubr.msk.bf16.vlgmr.msra.gmra.mxu1 %vm890_vm4, %v1126_v62  ;;  %v3502_v62 = vld [vmem:[%s4318_s12 + $0x38] sm:$0xff]  }
 0x4c1   : > { %3315 = vmatpush3.bf16.msra.mxu1 %v1245_v0  ;;  %3316 = vmatprep.mubr.msk.bf16.mxu1 %vm3634_vm1, %v3633_v28  ;;  %v3504_v0 = vld [vmem:[%s4318_s12 + $0x28] sm:$0xff]  }
 0x4c2   : > { %3332 = vmatprep.subr.bf16.mxu1 %v3633_v28 }
 0x4c8   : > { %3317 = vmatmul.mubr.msk.bf16.vlgmr.msra.gmra.mxu1 %vm890_vm4, %v1238_v2  ;;  %v3506_v2 = vld [vmem:[%s4318_s12 + $0x18] sm:$0xff]  }
 0x4c9   : > { %3340 = vmatprep.mubr.msk.bf16.mxu1 %vm3634_vm1, %v3633_v28  ;;  %3333 = vmatpush3.bf16.msra.mxu1 %v3498_v49 }
 0x4ca   : > { %3334 = vmatprep.subr.bf16.mxu1 %v3633_v28 }
 0x54b   : > { %v944_v4 = vpop.f32.mrf.mxu1 }
 0x54d   : > { %v3282_v5 = vpop.f32.mrf.mxu1 }
 0x54e   : > { %v3509_v5 = vld [vmem:[%s4318_s12] sm:$0xff]  }
 0x54f   : > { %v947_v6 = vpop.f32.mrf.mxu1 }
 0x550   : > { %v3039_v6 = vld [vmem:[%s4317_s11] ss:$0 sm:$0xff] }
 0x551   : > { %v3283_v7 = vpop.f32.mrf.mxu1 }
 0x553   : > { %v1057_v8 = vpop.f32.mrf.mxu1 }
 0x554   : > { %1288 = vrot.lane.b32.xlu1 %v1057_v8, %s4338_s27  ;;  %s4362_s27 = smov 112  }
 0x555   : > { %v3294_v9 = vpop.f32.mrf.mxu1 }
 0x557   : > { %v1060_v10 = vpop.f32.mrf.mxu1 }
 0x559   : > { %v3295_v12 = vpop.f32.mrf.mxu1 }
 0x580   : > { %v1169_v16 = vpop.f32.mrf.mxu1 }
 0x581   : > { %1292 = vrot.lane.b32.xlu0 %v1169_v16, %s4340_s26  ;;  %s4361_s26 = smov 96  }
 0x582   : > { %v3306_v17 = vpop.f32.mrf.mxu1 }
 0x584   : > { %v1172_v18 = vpop.f32.mrf.mxu1 }
 0x586   : > { %v3307_v19 = vpop.f32.mrf.mxu1 }
 0x588   : > { %v1281_v20 = vpop.f32.mrf.mxu1 }
 0x589   : > { %1296 = vrot.lane.b32.xlu1 %v1281_v20, %s4343_s25  ;;  %s4364_s25 = smov 32  }
 0x58a   : > { %v3318_v21 = vpop.f32.mrf.mxu1 }
 0x58c   : > { %v1284_v22 = vpop.f32.mrf.mxu1 }
 0x58e   : > { %v3319_v23 = vpop.f32.mrf.mxu1 }
 0x58f   : > { %v3045_v23 = vld [vmem:[%s4319_s13] ss:$0 sm:$0xff] }
 0x5c6   : > { %v1289_v25 = vpop.permute.xlu1 %1288 }
 0x5c7   : > { %v1299_v27 = vsel %vm835_vm2, %v944_v4, %v1289_v25  ;;  %v3508_v4 = vld [vmem:[%s4318_s12 + $0x8] sm:$0xff]  }
 0x5f3   : > { %v1293_v26 = vpop.permute.xlu0 %1292 }
 0x5f4   : > { %v1301_v30 = vsel %vm1300_vm5, %v1299_v27, %v1293_v26 }
 0x5fb   : > { %v1297_v31 = vpop.permute.xlu1 %1296 }
 0x5fc   : > { %v1303_v32 = vsel %vm1302_vm6, %v1301_v30, %v1297_v31 }
 0x5fd   : > { %v1312_v33 = vpack.c.bf16 %v1303_v32, %v1303_v32 }
 0x5ff   : > { %3329 = vmatmul.mubr.msk.bf16.vlgmr.msra.gmra.mxu0 %vm696_vm0, %v1312_v33 }
 0x600   : > { %3360 = vmatprep.mubr.msk.bf16.mxu0 %vm3634_vm1, %v3633_v28  ;;  %3345 = vmatpush3.bf16.msra.mxu0 %v3502_v62 }
 0x601   : > { %3346 = vmatprep.subr.bf16.mxu0 %v3633_v28 }
 0x604   : > { %3347 = vmatpush3.bf16.msra.mxu0 %v3503_v63 }
 0x605   : > { %3348 = vmatprep.subr.bf16.mxu0 %v3633_v28 }
 0x608   : > { %3349 = vmatpush3.bf16.msra.mxu0 %v3504_v0 }
 0x609   : > { %3350 = vmatprep.subr.bf16.mxu0 %v3633_v28 }
 0x60c   : > { %3351 = vmatpush3.bf16.msra.mxu0 %v3505_v1 }
 0x60d   : > { %3352 = vmatprep.subr.bf16.mxu0 %v3633_v28 }
 0x610   : > { %3353 = vmatpush3.bf16.msra.mxu0 %v3506_v2 }
 0x611   : > { %3354 = vmatprep.subr.bf16.mxu0 %v3633_v28 }
 0x614   : > { %3355 = vmatpush3.bf16.msra.mxu0 %v3507_v3 }
 0x615   : > { %3356 = vmatprep.subr.bf16.mxu0 %v3633_v28 }
 0x618   : > { %3357 = vmatpush3.bf16.msra.mxu0 %v3508_v4 }
 0x619   : > { %3358 = vmatprep.subr.bf16.mxu0 %v3633_v28 }
 0x61c   : > { %3359 = vmatpush3.bf16.msra.mxu0 %v3509_v5 }
 0x61d   : > { %3376 = vmatprep.subr.bf16.mxu0 %v3633_v28 }
 0x6bf   : > { %v1381_v35 = vpop.f32.mrf.mxu0 }
 0x6c0   : > { %v1382_v36 = vadd.f32 %v3031_v34, %v1381_v35 }
 0x6c1   : > { %v3330_v37 = vpop.f32.mrf.mxu0 }
 0x6c2   : > { %v1387_v39 = vadd.f32 %v1382_v36, %v3804_v24  ;;  %v3499_v24 = vld [vmem:[%s4316_s10 + $0x10] sm:$0xff]  }
 0x6c3   : > { %v1384_v40 = vpop.f32.mrf.mxu0  ;;  %3335 = vmatpush3.bf16.msra.mxu1 %v3499_v24 }
 0x6c4   : > { %v1390_v41 = vsel %vm696_vm0, %v1387_v39, 0.0  ;;  %3336 = vmatprep.subr.bf16.mxu1 %v3633_v28  ;;  %v3512_v40 = vld [vmem:[%s4353_s24 + $0x74] ss:$8 sps:$4 sm:$0xff]  }
 0x6c5   : > { %1391 = vadd.xlane.f32.xlu0 %v1390_v41  ;;  %v3331_v42 = vpop.f32.mrf.mxu0  ;;  %v3510_v41 = vld [vmem:[%s4353_s24 + $0x70] ss:$8 sps:$4 sm:$0xff]  }
 0x6c6   : > { %v3515_v42 = vld [vmem:[%s4353_s24 + $0x64] ss:$8 sps:$4 sm:$0xff]  }
 0x6c7   : > { %3337 = vmatpush3.bf16.msra.mxu1 %v3500_v50 }
 0x6c8   : > { %3338 = vmatprep.subr.bf16.mxu1 %v3633_v28 }
 0x6cb   : > { %3339 = vmatpush3.bf16.msra.mxu1 %v3501_v51 }
 0x6cc   : > { %1725 = vmatprep.subr.bf16.mxu1 %v3512_v40 }
 0x74e   : > { %v1392_v43 = vpop.xlane.xlu0 %1391 }
 0x74f   : > { %v1393_v45 = vmul.f32 0.015625, %v1392_v43  ;;  %v3513_v43 = vld [vmem:[%s4353_s24 + $0x60] ss:$8 sps:$4 sm:$0xff]  }
 0x751   : > { %v1394_v46 = vsub.f32 %v1387_v39, %v1393_v45  ;;  %v3518_v45 = vld [vmem:[%s4353_s24 + $0x54] ss:$8 sps:$4 sm:$0xff]  }
 0x753   : > { %v1395_v47 = vmul.f32 %v1394_v46, %v1394_v46 }
 0x755   : > { %v1396_v48 = vsel %vm696_vm0, %v1395_v47, 0.0  ;;  %v3521_v47 = vld [vmem:[%s4353_s24 + $0x44] ss:$8 sps:$4 sm:$0xff]  }
 0x756   : > { %1397 = vadd.xlane.f32.xlu1 %v1396_v48  ;;  %v3519_v48 = vld [vmem:[%s4353_s24 + $0x40] ss:$8 sps:$4 sm:$0xff]  }
 0x7df   : > { %v1398_v52 = vpop.xlane.xlu1 %1397 }
 0x7e0   : > { %v1399_v53 = vmul.f32 0.015625, %v1398_v52  ;;  %v3054_v52 = vld [vmem:[%s4320_s14] ss:$0 sm:$0xff] }
 0x7e2   : > { %v1400_v44 = vadd.f32 1e-12, %v1399_v53 }
 0x7e4   : > { %3586 = vrsqrt.f32 %v1400_v44  ;;  %v3055_v44 = vld [vmem:[%s4321_s15] ss:$0 sm:$0xff] }
 0x7f1   : > { %v3587_v55 = vpop.eup %3586 }
 0x7f2   : > { %v1402_v57 = vmul.f32 %v3587_v55, %v1394_v46  ;;  %v3516_v46 = vld [vmem:[%s4353_s24 + $0x50] ss:$8 sps:$4 sm:$0xff]  }
 0x7f4   : > { %v1409_v59 = vmul.f32 %v3037_v56, %v1402_v57 }
 0x7f6   : > { %v1416_v60 = vadd.f32 %v3038_v58, %v1409_v59  ;;  %v3064_v58 = vld [vmem:[%s4356_s1 + $0x2] sm:$0x3] }
 0x7f7   : > { %v1667_v59 = vrot.slane %v3064_v58, %v3811_v29  ;;  %v1671_v2 = vrot.slane %v3064_v58, %v3828_v38 }
 0x7f8   : > { %v1425_v61 = vpack.c.bf16 %v1416_v60, %v1416_v60 }
 0x7fa   : > { %3341 = vmatmul.mubr.msk.bf16.vlgmr.msra.gmra.mxu1 %vm696_vm0, %v1425_v61 }
 0x7fb   : > { %1749 = vmatprep.mubr.bf16.mxu1 %v3632_v11  ;;  %1726 = vmatpush1.bf16.msra.mxu1 %v3510_v41 }
 0x7fc   : > { %1727 = vmatprep.subr.bf16.mxu1 %v3515_v42 }
 0x7ff   : > { %1728 = vmatpush1.bf16.msra.mxu1 %v3513_v43 }
 0x800   : > { %1729 = vmatprep.subr.bf16.mxu1 %v3518_v45 }
 0x803   : > { %1730 = vmatpush1.bf16.msra.mxu1 %v3516_v46 }
 0x804   : > { %1731 = vmatprep.subr.bf16.mxu1 %v3521_v47 }
 0x807   : > { %1732 = vmatpush1.bf16.msra.mxu1 %v3519_v48 }
 0x808   : > { %3364 = vmatprep.subr.bf16.mxu1 %v3633_v28 }
 0x8ba   : > { %v1494_v7 = vpop.f32.mrf.mxu1 }
 0x8bb   : > { %v1495_v8 = vadd.f32 %v3039_v6, %v1494_v7 }
 0x8bc   : > { %v3342_v9 = vpop.f32.mrf.mxu1 }
 0x8bd   : > { %v1500_v10 = vmul.f32 %v1495_v8, %v1495_v8 }
 0x8be   : > { %v1497_v12 = vpop.f32.mrf.mxu1 }
 0x8bf   : > { %v1501_v13 = vmul.f32 %v1500_v10, %v1495_v8 }
 0x8c0   : > { %v3343_v14 = vpop.f32.mrf.mxu1 }
 0x8c1   : > { %v1502_v15 = vmul.f32 0.044715, %v1501_v13 }
 0x8c3   : > { %v1503_v16 = vadd.f32 %v1502_v15, %v1495_v8 }
 0x8c5   : > { %v1504_v17 = vmul.f32 0.7978846, %v1503_v16 }
 0x8c7   : > { %3588 = vtanh.f32 %v1504_v17 }
 0x8d4   : > { %v3589_v18 = vpop.eup %3588 }
 0x8d5   : > { %v1506_v19 = vadd.f32 1.0, %v3589_v18 }
 0x8d7   : > { %v1507_v20 = vmul.f32 0.5, %v1506_v19 }
 0x8d9   : > { %v1508_v21 = vmul.f32 %v1507_v20, %v1495_v8 }
 0x8db   : > { %v1525_v22 = vpack.c.bf16 %v1508_v21, %v1508_v21 }
 0x8dd   : > { %3361 = vmatmul.mubr.bf16.vlgmr.msra.gmra.mxu0 %v1525_v22 }
 0x8de   : > { %3378 = vmatprep.mubr.msk.bf16.mxu0 %vm3634_vm1, %v3633_v28 }
 0x99d   : > { %v1615_v25 = vpop.f32.mrf.mxu0 }
 0x99e   : > { %v1616_v26 = vadd.f32 %v3045_v23, %v1615_v25 }
 0x99f   : > { %v3362_v27 = vpop.f32.mrf.mxu0 }
 0x9a0   : > { %v1621_v30 = vadd.f32 %v1616_v26, %v1416_v60 }
 0x9a1   : > { %v1618_v31 = vpop.f32.mrf.mxu0 }
 0x9a2   : > { %v1624_v32 = vsel %vm696_vm0, %v1621_v30, 0.0 }
 0x9a3   : > { %1625 = vadd.xlane.f32.xlu0 %v1624_v32  ;;  %v3363_v33 = vpop.f32.mrf.mxu0 }
 0xa2c   : > { %v1626_v34 = vpop.xlane.xlu0 %1625 }
 0xa2d   : > { %v1627_v35 = vmul.f32 0.015625, %v1626_v34 }
 0xa2f   : > { %v1628_v36 = vsub.f32 %v1621_v30, %v1627_v35 }
 0xa31   : > { %v1629_v37 = vmul.f32 %v1628_v36, %v1628_v36 }
 0xa33   : > { %v1630_v39 = vsel %vm696_vm0, %v1629_v37, 0.0 }
 0xa34   : > { %1631 = vadd.xlane.f32.xlu0 %v1630_v39 }
 0xabd   : > { %v1632_v49 = vpop.xlane.xlu0 %1631 }
 0xabe   : > { %v1633_v24 = vmul.f32 0.015625, %v1632_v49 }
 0xac0   : > { %v1634_v50 = vadd.f32 1e-12, %v1633_v24 }
 0xac2   : > { %3590 = vrsqrt.f32 %v1634_v50 }
 0xacf   : > { %v3591_v51 = vpop.eup %3590 }
 0xad0   : > { %v1636_v53 = vmul.f32 %v3591_v51, %v1628_v36 }
 0xad2   : > { %v1643_v55 = vmul.f32 %v3054_v52, %v1636_v53 }
 0xad4   : > { %v4025_v56 = vadd.f32 %v3055_v44, %v1643_v55 }
 0xad6   : > { %v1660_v57 = vpack.c.bf16 %v4025_v56, %v4025_v56 }
 0xad8   : > { %3073 = vmatmul.mubr.msk.bf16.vlgmr.msra.gmra.mxu1 %vm696_vm0, %v1660_v57 }
 0xad9   : > { %3366 = vmatprep.mubr.msk.bf16.mxu1 %vm3634_vm1, %v3633_v28 }
 0xb98   : > { %v1751_v60 = vpop.f32.mrf.mxu1 }
 0xb99   : > { %v1752_v61 = vadd.f32 %v1751_v60, %v1667_v59 }
 0xb9a   : > { %v1753_v62 = vpop.f32.mrf.mxu1 }
 0xb9b   : > { %v1758_v63 = vpack.c.bf16 %v1752_v61, %v1752_v61  ;;  %v1754_v5 = vadd.f32 %v1753_v62, %v1671_v2 }
 0xb9c   : > { %v1755_v0 = vpop.f32.mrf.mxu1 }
 0xb9d   : > { %1871 = vrot.lane.b32.xlu0 %v1758_v63, %s4359_s30  ;;  %1761 = vrot.lane.b32.xlu1 %v1758_v63, %s4360_s4  ;;  %v4048_v9 = vpack.c.bf16 %v1754_v5, %v1754_v5 }
 0xb9e   : > { %v1756_v1 = vpop.f32.mrf.mxu1 }
 0xb9f   : > { %v1827_v13 = vsel %vm906_vm3, %v4048_v9, 0 }
 0xba1   : > { %1982 = vrot.lane.b32.xlu0 %v1758_v63, %s4361_s26  ;;  %1869 = vrot.lane.b32.xlu1 %v1758_v63, %s4362_s27 }
 0xba5   : > { %2094 = vrot.lane.b32.xlu0 %v1758_v63, %s4363_s6  ;;  %1984 = vrot.lane.b32.xlu1 %v1758_v63, %s4364_s25 }
 0xba9   : > { %2096 = vrot.lane.b32.xlu1 %v1758_v63, %s4365_s5 }
 0xc0f   : > { %v1872_v3 = vpop.permute.xlu0 %1871  ;;  %v1762_v4 = vpop.permute.xlu1 %1761 }
 0xc10   : > { %v1877_v6 = vsel %vm835_vm2, %v1872_v3, 0  ;;  %v1767_v7 = vsel %vm835_vm2, %v1762_v4, 0 }
 0xc11   : > { %3365 = vmatpush3.bf16.xpose.msra.mxu1 %v1767_v7  ;;  %3377 = vmatpush3.bf16.xpose.msra.mxu0 %v1877_v6 }
 0xc12   : > { %3370 = vmatprep.subr.bf16.mxu1 %v3633_v28  ;;  %3388 = vmatprep.subr.bf16.mxu0 %v3633_v28 }
 0xc13   : > { %v1870_v8 = vpop.permute.xlu1 %1869  ;;  %v1983_v15 = vpop.permute.xlu0 %1982 }
 0xc17   : > { %v1985_v10 = vpop.permute.xlu1 %1984  ;;  %v2095_v17 = vpop.permute.xlu0 %2094 }
 0xc18   : > { %v1990_v12 = vsel %vm835_vm2, %v1985_v10, 0  ;;  %3367 = vmatmul.mubr.msk.bf16.vlgmr.msra.gmra.mxu1 %vm835_vm2, %v1758_v63  ;;  %3379 = vmatmul.mubr.msk.bf16.vlgmr.msra.gmra.mxu0 %vm835_vm2, %v1870_v8 }
 0xc19   : > { %3371 = vmatpush3.bf16.msra.mxu1 %v1827_v13  ;;  %3389 = vmatpush3.bf16.xpose.msra.mxu0 %v1990_v12 }
 0xc1a   : > { %3390 = vmatprep.mubr.msk.bf16.mxu0 %vm3634_vm1, %v3633_v28  ;;  %3400 = vmatprep.subr.bf16.mxu0 %v3633_v28 }
 0xc1b   : > { %3372 = vmatprep.mubr.msk.bf16.mxu1 %vm3634_vm1, %v3633_v28  ;;  %3382 = vmatprep.subr.bf16.mxu1 %v3633_v28  ;;  %v2097_v14 = vpop.permute.xlu1 %2096 }
 0xc1c   : > { %v2102_v16 = vsel %vm835_vm2, %v2097_v14, 0 }
 0xc20   : > { %3391 = vmatmul.mubr.msk.bf16.vlgmr.msra.gmra.mxu0 %vm835_vm2, %v1983_v15 }
 0xc21   : > { %3401 = vmatpush3.bf16.xpose.msra.mxu0 %v2102_v16  ;;  %3402 = vmatprep.mubr.msk.bf16.mxu0 %vm3634_vm1, %v3633_v28 }
 0xc22   : > { %3412 = vmatprep.subr.bf16.mxu0 %v3633_v28 }
 0xc28   : > { %3403 = vmatmul.mubr.msk.bf16.vlgmr.msra.gmra.mxu0 %vm835_vm2, %v2095_v17 }
 0xc29   : > { %3420 = vmatprep.mubr.msk.bf16.mxu0 %vm3634_vm1, %v3633_v28 }
 0xcd8   : > { %v1803_v18 = vpop.f32.mrf.mxu1  ;;  %v1913_v19 = vpop.f32.mrf.mxu0 }
 0xcd9   : > { %v1809_v20 = vmul.f32 0.25, %v1803_v18  ;;  %v1919_v21 = vmul.f32 0.25, %v1913_v19 }
 0xcda   : > { %v3368_v22 = vpop.f32.mrf.mxu1  ;;  %v3380_v23 = vpop.f32.mrf.mxu0 }
 0xcdb   : > { %v1810_v25 = vadd.f32 %v3860_v54, %v1809_v20  ;;  %v1920_v26 = vadd.f32 %v3860_v54, %v1919_v21 }
 0xcdc   : > { %v1806_v27 = vpop.f32.mrf.mxu1  ;;  %v1916_v30 = vpop.f32.mrf.mxu0 }
 0xcdd   : > { %v1811_v31 = vsel %vm890_vm4, %v1810_v25, -inf  ;;  %v1921_v32 = vsel %vm890_vm4, %v1920_v26, -inf }
 0xcde   : > { %1812 = vmax.xlane.f32.xlu1 %v1811_v31  ;;  %v3369_v33 = vpop.f32.mrf.mxu1  ;;  %1922 = vmax.xlane.f32.xlu0 %v1921_v32  ;;  %v3381_v34 = vpop.f32.mrf.mxu0 }
 0xce0   : > { %v2026_v35 = vpop.f32.mrf.mxu0 }
 0xce1   : > { %v2032_v36 = vmul.f32 0.25, %v2026_v35  ;;  %v3522_v35 = vld [vmem:[%s4358_s0 + $0x38] sm:$0xff]  }
 0xce2   : > { %v3392_v37 = vpop.f32.mrf.mxu0  ;;  %3413 = vmatpush3.bf16.msra.mxu0 %v3522_v35 }
 0xce3   : > { %v2033_v39 = vadd.f32 %v3860_v54, %v2032_v36  ;;  %v3523_v37 = vld [vmem:[%s4358_s0 + $0x30] sm:$0xff]   ;;  %3414 = vmatprep.subr.bf16.mxu0 %v3633_v28 }
 0xce4   : > { %v2029_v40 = vpop.f32.mrf.mxu0 }
 0xce5   : > { %v2034_v41 = vsel %vm890_vm4, %v2033_v39, -inf }
 0xce6   : > { %2035 = vmax.xlane.f32.xlu0 %v2034_v41  ;;  %v3393_v42 = vpop.f32.mrf.mxu0  ;;  %3415 = vmatpush3.bf16.msra.mxu0 %v3523_v37  ;;  %v3524_v41 = vld [vmem:[%s4358_s0 + $0x28] sm:$0xff]  }
 0xce7   : > { %3416 = vmatprep.subr.bf16.mxu0 %v3633_v28 }
 0xce8   : > { %v2138_v43 = vpop.f32.mrf.mxu0 }
 0xce9   : > { %v2144_v45 = vmul.f32 0.25, %v2138_v43 }
 0xcea   : > { %v3404_v46 = vpop.f32.mrf.mxu0  ;;  %3417 = vmatpush3.bf16.msra.mxu0 %v3524_v41 }
 0xceb   : > { %v2145_v47 = vadd.f32 %v3860_v54, %v2144_v45  ;;  %3418 = vmatprep.subr.bf16.mxu0 %v3633_v28 }
 0xcec   : > { %v2141_v48 = vpop.f32.mrf.mxu0 }
 0xced   : > { %v2146_v49 = vsel %vm890_vm4, %v2145_v47, -inf }
 0xcee   : > { %2147 = vmax.xlane.f32.xlu1 %v2146_v49  ;;  %v3405_v24 = vpop.f32.mrf.mxu0  ;;  %v3525_v49 = vld [vmem:[%s4358_s0 + $0x20] sm:$0xff]  }
 0xcef   : > { %3419 = vmatpush3.bf16.msra.mxu0 %v3525_v49 }
 0xcf0   : > { %3436 = vmatprep.subr.bf16.mxu0 %v3633_v28 }
 0xd67   : > { %v1813_v50 = vpop.xlane.xlu1 %1812  ;;  %v1923_v51 = vpop.xlane.xlu0 %1922 }
 0xd68   : > { %v1814_v52 = vsub.f32 %v1810_v25, %v1813_v50  ;;  %v1924_v53 = vsub.f32 %v1920_v26, %v1923_v51 }
 0xd6a   : > { %v1815_v44 = vmul.f32 1.442695, %v1814_v52  ;;  %v1925_v55 = vmul.f32 1.442695, %v1924_v53 }
 0xd6c   : > { %3592 = vpow2.f32 %v1815_v44 }
 0xd6d   : > { %3594 = vpow2.f32 %v1925_v55 }
 0xd6f   : > { %v2036_v57 = vpop.xlane.xlu0 %2035 }
 0xd70   : > { %v2037_v58 = vsub.f32 %v2033_v39, %v2036_v57 }
 0xd72   : > { %v2038_v59 = vmul.f32 1.442695, %v2037_v58 }
 0xd74   : > { %3596 = vpow2.f32 %v2038_v59 }
 0xd77   : > { %v2148_v1 = vpop.xlane.xlu1 %2147 }
 0xd78   : > { %v2149_v2 = vsub.f32 %v2145_v47, %v2148_v1 }
 0xd79   : > { %v3593_v60 = vpop.eup %3592 }
 0xd7a   : > { %v3595_v61 = vpop.eup %3594  ;;  %v1817_v54 = vsel %vm890_vm4, %v3593_v60, 0.0  ;;  %v2150_v3 = vmul.f32 1.442695, %v2149_v2 }
 0xd7b   : > { %1818 = vadd.xlane.f32.xlu0 %v1817_v54  ;;  %v1927_v62 = vsel %vm890_vm4, %v3595_v61, 0.0 }
 0xd7c   : > { %1928 = vadd.xlane.f32.xlu1 %v1927_v62  ;;  %3598 = vpow2.f32 %v2150_v3 }
 0xd81   : > { %v3597_v63 = vpop.eup %3596 }
 0xd82   : > { %v2040_v0 = vsel %vm890_vm4, %v3597_v63, 0.0 }
 0xd83   : > { %2041 = vadd.xlane.f32.xlu0 %v2040_v0 }
 0xd89   : > { %v3599_v4 = vpop.eup %3598 }
 0xd8a   : > { %v2152_v5 = vsel %vm890_vm4, %v3599_v4, 0.0 }
 0xd8d   : > { %2046 = vrot.lane.b32.xlu1 %v4048_v9, %s4361_s26 }
 0xd99   : > { %1934 = vrot.lane.b32.xlu0 %v4048_v9, %s4362_s27 }
 0xdb1   : > { %2153 = vadd.xlane.f32.xlu1 %v2152_v5 }
 0xdc2   : > { %2158 = vrot.lane.b32.xlu1 %v4048_v9, %s4363_s6  ;;  %s690_s6 = scalar_lea.vmem %s4328_s22, %s4367_s28 }
 0xe04   : > { %v1819_v6 = vpop.xlane.xlu0 %1818 }
 0xe05   : > { %3600 = vrcp.f32 %v1819_v6  ;;  %v1929_v7 = vpop.xlane.xlu1 %1928 }
 0xe06   : > { %3602 = vrcp.f32 %v1929_v7 }
 0xe09   : > { %v2047_v17 = vpop.permute.xlu1 %2046 }
 0xe0a   : > { %v2052_v20 = vsel %vm906_vm3, %v2047_v17, 0  ;;  %v3099_v17 = vld [vmem:[%s4314_s8 + $0x1] ss:$0 sm:$0xff] }
 0xe0c   : > { %v2042_v8 = vpop.xlane.xlu0 %2041 }
 0xe0d   : > { %3604 = vrcp.f32 %v2042_v8 }
 0xe10   : > { %v1935_v13 = vpop.permute.xlu0 %1934 }
 0xe11   : > { %v1940_v16 = vsel %vm906_vm3, %v1935_v13, 0  ;;  %v3529_v13 = vld [vmem:[%s4316_s10 + $0x20] sm:$0xff]  }
 0xe12   : > { %v3601_v10 = vpop.eup %3600 }
 0xe13   : > { %v1821_v12 = vmul.f32 %v3601_v10, %v3593_v60  ;;  %v3603_v15 = vpop.eup %3602  ;;  %v3526_v10 = vld [vmem:[%s4316_s10 + $0x38] sm:$0xff]  }
 0xe14   : > { %v1931_v9 = vmul.f32 %v3603_v15, %v3595_v61  ;;  %v3091_v61 = vld [vmem:[%s4313_s7 + $0x1] ss:$0 sm:$0xff] }
 0xe15   : > { %v1822_v14 = vpack.c.bf16 %v1821_v12, %v1821_v12  ;;  %v3528_v12 = vld [vmem:[%s4316_s10 + $0x28] sm:$0xff]  }
 0xe16   : > { %v1932_v18 = vpack.c.bf16 %v1931_v9, %v1931_v9 }
 0xe17   : > { %3373 = vmatmul.mubr.msk.bf16.vlgmr.msra.gmra.mxu1 %vm890_vm4, %v1822_v14 }
 0xe18   : > { %3383 = vmatpush3.bf16.msra.mxu1 %v1940_v16  ;;  %3384 = vmatprep.mubr.msk.bf16.mxu1 %vm3634_vm1, %v3633_v28 }
 0xe19   : > { %3394 = vmatprep.subr.bf16.mxu1 %v3633_v28 }
 0xe1a   : > { %v3605_v19 = vpop.eup %3604 }
 0xe1b   : > { %v2044_v21 = vmul.f32 %v3605_v19, %v3597_v63  ;;  %v3100_v19 = vld [vmem:[%s4315_s9 + $0x1] ss:$0 sm:$0xff] }
 0xe1d   : > { %v2045_v22 = vpack.c.bf16 %v2044_v21, %v2044_v21 }
 0xe1f   : > { %3385 = vmatmul.mubr.msk.bf16.vlgmr.msra.gmra.mxu1 %vm890_vm4, %v1932_v18 }
 0xe20   : > { %3395 = vmatpush3.bf16.msra.mxu1 %v2052_v20  ;;  %3396 = vmatprep.mubr.msk.bf16.mxu1 %vm3634_vm1, %v3633_v28 }
 0xe21   : > { %3406 = vmatprep.subr.bf16.mxu1 %v3633_v28 }
 0xe27   : > { %3397 = vmatmul.mubr.msk.bf16.vlgmr.msra.gmra.mxu1 %vm890_vm4, %v2045_v22 }
 0xe28   : > { %3408 = vmatprep.mubr.msk.bf16.mxu1 %vm3634_vm1, %v3633_v28 }
 0xe3a   : > { %v2154_v23 = vpop.xlane.xlu1 %2153 }
 0xe3b   : > { %3606 = vrcp.f32 %v2154_v23  ;;  %v3530_v23 = vld [vmem:[%s4318_s12 + $0x78] sm:$0xff]  }
 0xe3e   : > { %v2159_v25 = vpop.permute.xlu1 %2158 }
 0xe3f   : > { %v2164_v26 = vsel %vm906_vm3, %v2159_v25, 0  ;;  %v3531_v25 = vld [vmem:[%s4318_s12 + $0x70] sm:$0xff]  }
 0xe40   : > { %3407 = vmatpush3.bf16.msra.mxu1 %v2164_v26  ;;  %v3532_v26 = vld [vmem:[%s4318_s12 + $0x68] sm:$0xff]  }
 0xe41   : > { %3424 = vmatprep.subr.bf16.mxu1 %v3633_v28 }
 0xe48   : > { %v3607_v27 = vpop.eup %3606 }
 0xe49   : > { %v2156_v30 = vmul.f32 %v3607_v27, %v3599_v4  ;;  %v3534_v27 = vld [vmem:[%s4318_s12 + $0x58] sm:$0xff]  }
 0xe4b   : > { %v2157_v31 = vpack.c.bf16 %v2156_v30, %v2156_v30  ;;  %v3535_v30 = vld [vmem:[%s4318_s12 + $0x50] sm:$0xff]  }
 0xe4d   : > { %3409 = vmatmul.mubr.msk.bf16.vlgmr.msra.gmra.mxu1 %vm890_vm4, %v2157_v31  ;;  %v3536_v31 = vld [vmem:[%s4318_s12 + $0x48] sm:$0xff]  }
 0xe4e   : > { %3432 = vmatprep.mubr.msk.bf16.mxu1 %vm3634_vm1, %v3633_v28  ;;  %3425 = vmatpush3.bf16.msra.mxu1 %v3526_v10 }
 0xe4f   : > { %3426 = vmatprep.subr.bf16.mxu1 %v3633_v28 }
 0xed7   : > { %v1863_v32 = vpop.f32.mrf.mxu1 }
 0xed9   : > { %v3374_v33 = vpop.f32.mrf.mxu1 }
 0xeda   : > { %v3110_v33 = vld [vmem:[%s4317_s11 + $0x1] ss:$0 sm:$0xff] }
 0xedb   : > { %v1866_v34 = vpop.f32.mrf.mxu1 }
 0xedd   : > { %v3375_v36 = vpop.f32.mrf.mxu1 }
 0xedf   : > { %v1976_v39 = vpop.f32.mrf.mxu1 }
 0xee0   : > { %2207 = vrot.lane.b32.xlu0 %v1976_v39, %s4365_s5 }
 0xee1   : > { %v3386_v40 = vpop.f32.mrf.mxu1 }
 0xee3   : > { %v1979_v42 = vpop.f32.mrf.mxu1 }
 0xee5   : > { %v3387_v43 = vpop.f32.mrf.mxu1 }
 0xee7   : > { %v2088_v45 = vpop.f32.mrf.mxu1 }
 0xee8   : > { %2211 = vrot.lane.b32.xlu1 %v2088_v45, %s4364_s25 }
 0xee9   : > { %v3398_v46 = vpop.f32.mrf.mxu1 }
 0xeeb   : > { %v2091_v47 = vpop.f32.mrf.mxu1 }
 0xeed   : > { %v3399_v48 = vpop.f32.mrf.mxu1 }
 0xf0d   : > { %v2200_v24 = vpop.f32.mrf.mxu1 }
 0xf0e   : > { %2215 = vrot.lane.b32.xlu0 %v2200_v24, %s4359_s30 }
 0xf0f   : > { %v3410_v50 = vpop.f32.mrf.mxu1 }
 0xf10   : > { %v3133_v50 = vld [vmem:[%s4319_s13 + $0x1] ss:$0 sm:$0xff] }
 0xf11   : > { %v2203_v51 = vpop.f32.mrf.mxu1 }
 0xf13   : > { %v3411_v52 = vpop.f32.mrf.mxu1 }
 0xf52   : > { %v2208_v53 = vpop.permute.xlu0 %2207 }
 0xf53   : > { %v2218_v55 = vsel %vm835_vm2, %v1863_v32, %v2208_v53  ;;  %v3537_v32 = vld [vmem:[%s4318_s12 + $0x40] sm:$0xff]  }
 0xf5a   : > { %v2212_v44 = vpop.permute.xlu1 %2211 }
 0xf5b   : > { %v2219_v57 = vsel %vm1300_vm5, %v2218_v55, %v2212_v44 }
 0xf80   : > { %v2216_v58 = vpop.permute.xlu0 %2215 }
 0xf81   : > { %v2220_v59 = vsel %vm1302_vm6, %v2219_v57, %v2216_v58 }
 0xf82   : > { %v2230_v60 = vpack.c.bf16 %v2220_v59, %v2220_v59 }
 0xf84   : > { %3421 = vmatmul.mubr.msk.bf16.vlgmr.msra.gmra.mxu0 %vm696_vm0, %v2230_v60 }
 0xf85   : > { %3452 = vmatprep.mubr.msk.bf16.mxu0 %vm3634_vm1, %v3633_v28  ;;  %3437 = vmatpush3.bf16.msra.mxu0 %v3530_v23  ;;  %v3556_v23 = vld [vmem:[%s4324_s18 + $0x60] sm:$0xff]  }
 0xf86   : > { %3438 = vmatprep.subr.bf16.mxu0 %v3633_v28 }
 0xf89   : > { %3439 = vmatpush3.bf16.msra.mxu0 %v3531_v25  ;;  %v3557_v25 = vld [vmem:[%s4324_s18 + $0x20] sm:$0xff]  }
 0xf8a   : > { %3440 = vmatprep.subr.bf16.mxu0 %v3633_v28 }
 0xf8d   : > { %3441 = vmatpush3.bf16.msra.mxu0 %v3532_v26  ;;  %v3558_v26 = vld [vmem:[%s4324_s18 + $0x58] sm:$0xff]  }
 0xf8e   : > { %3442 = vmatprep.subr.bf16.mxu0 %v3633_v28 }
0x1044   : > { %v2300_v54 = vpop.f32.mrf.mxu0 }
0x1045   : > { %v2301_v62 = vadd.f32 %v3091_v61, %v2300_v54 }
0x1046   : > { %v3422_v63 = vpop.f32.mrf.mxu0 }
0x1047   : > { %v2306_v0 = vadd.f32 %v2301_v62, %v4025_v56  ;;  %v3527_v56 = vld [vmem:[%s4316_s10 + $0x30] sm:$0xff]  }
0x1048   : > { %v2303_v1 = vpop.f32.mrf.mxu0  ;;  %3427 = vmatpush3.bf16.msra.mxu1 %v3527_v56  ;;  %v3540_v63 = vld [vmem:[%s4322_s16 + $0x34] ss:$8 sps:$4 sm:$0xff]  }
0x1049   : > { %v2311_v2 = vsel %vm696_vm0, %v2306_v0, 0.0  ;;  %3428 = vmatprep.subr.bf16.mxu1 %v3633_v28  ;;  %v3543_v1 = vld [vmem:[%s4322_s16 + $0x24] ss:$8 sps:$4 sm:$0xff]  }
0x104a   : > { %2312 = vadd.xlane.f32.xlu1 %v2311_v2  ;;  %v3423_v3 = vpop.f32.mrf.mxu0  ;;  %v3541_v2 = vld [vmem:[%s4322_s16 + $0x20] ss:$8 sps:$4 sm:$0xff]  }
0x104b   : > { %v3546_v3 = vld [vmem:[%s4322_s16 + $0x14] ss:$8 sps:$4 sm:$0xff]  }
0x104c   : > { %3429 = vmatpush3.bf16.msra.mxu1 %v3528_v12  ;;  %v3144_v12 = vld [vmem:[%s4320_s14 + $0x1] ss:$0 sm:$0xff] }
0x104d   : > { %3430 = vmatprep.subr.bf16.mxu1 %v3633_v28 }
0x1050   : > { %3431 = vmatpush3.bf16.msra.mxu1 %v3529_v13 }
0x1051   : > { %2650 = vmatprep.subr.bf16.mxu1 %v3540_v63  ;;  %v3566_v63 = vld [vmem:[%s4326_s20 + $0x8] sm:$0xff]  }
0x10d3   : > { %v2313_v4 = vpop.xlane.xlu1 %2312 }
0x10d4   : > { %v2314_v5 = vmul.f32 0.015625, %v2313_v4  ;;  %v3544_v4 = vld [vmem:[%s4322_s16 + $0x10] ss:$8 sps:$4 sm:$0xff]  }
0x10d6   : > { %v2315_v6 = vsub.f32 %v2306_v0, %v2314_v5  ;;  %v3538_v0 = vld [vmem:[%s4322_s16 + $0x30] ss:$8 sps:$4 sm:$0xff]   ;;  %v3549_v5 = vld [vmem:[%s4322_s16 + $0x4] ss:$8 sps:$4 sm:$0xff]  }
0x10d8   : > { %v2316_v7 = vmul.f32 %v2315_v6, %v2315_v6 }
0x10da   : > { %v2317_v8 = vsel %vm696_vm0, %v2316_v7, 0.0 }
0x10db   : > { %2318 = vadd.xlane.f32.xlu0 %v2317_v8 }
0x1164   : > { %v2319_v14 = vpop.xlane.xlu0 %2318 }
0x1165   : > { %v2320_v15 = vmul.f32 0.015625, %v2319_v14  ;;  %v3145_v14 = vld [vmem:[%s4321_s15 + $0x1] ss:$0 sm:$0xff] }
0x1167   : > { %v2321_v16 = vadd.f32 1e-12, %v2320_v15 }
0x1169   : > { %3608 = vrsqrt.f32 %v2321_v16 }
0x1176   : > { %v3609_v9 = vpop.eup %3608 }
0x1177   : > { %v2323_v18 = vmul.f32 %v3609_v9, %v2315_v6  ;;  %v3547_v6 = vld [vmem:[%s4322_s16] ss:$8 sps:$4 sm:$0xff]  }
0x1179   : > { %v2330_v20 = vmul.f32 %v3099_v17, %v2323_v18  ;;  %v3550_v17 = vld [vmem:[%s4324_s18 + $0x78] sm:$0xff]  }
0x117a   : > { %v3551_v18 = vld [vmem:[%s4324_s18 + $0x38] sm:$0xff]  }
0x117b   : > { %v2337_v21 = vadd.f32 %v3100_v19, %v2330_v20  ;;  %v3552_v19 = vld [vmem:[%s4324_s18 + $0x70] sm:$0xff]  }
0x117c   : > { %v3553_v20 = vld [vmem:[%s4324_s18 + $0x30] sm:$0xff]  }
0x117d   : > { %v2347_v22 = vpack.c.bf16 %v2337_v21, %v2337_v21 }
0x117f   : > { %3433 = vmatmul.mubr.msk.bf16.vlgmr.msra.gmra.mxu1 %vm696_vm0, %v2347_v22  ;;  %v3555_v22 = vld [vmem:[%s4324_s18 + $0x28] sm:$0xff]  }
0x1180   : > { %2674 = vmatprep.mubr.bf16.mxu1 %v3632_v11  ;;  %v3533_v11 = vld [vmem:[%s4318_s12 + $0x60] sm:$0xff]   ;;  %2651 = vmatpush1.bf16.msra.mxu1 %v3538_v0 }
0x1181   : > { %3443 = vmatpush3.bf16.msra.mxu0 %v3533_v11  ;;  %2652 = vmatprep.subr.bf16.mxu1 %v3543_v1  ;;  %v3559_v11 = vld [vmem:[%s4324_s18 + $0x18] sm:$0xff]   ;;  %v3567_v0 = vld [vmem:[%s4326_s20] sm:$0xff]  }
0x1182   : > { %3444 = vmatprep.subr.bf16.mxu0 %v3633_v28 }
0x1184   : > { %2653 = vmatpush1.bf16.msra.mxu1 %v3541_v2  ;;  %v2735_v2 = vld [vmem:[%s4325_s19] sm:$0x1] }
0x1185   : > { %3445 = vmatpush3.bf16.msra.mxu0 %v3534_v27  ;;  %2654 = vmatprep.subr.bf16.mxu1 %v3546_v3  ;;  %v3560_v27 = vld [vmem:[%s4324_s18 + $0x50] sm:$0xff]  }
0x1186   : > { %3446 = vmatprep.subr.bf16.mxu0 %v3633_v28 }
0x1188   : > { %2655 = vmatpush1.bf16.msra.mxu1 %v3544_v4 }
0x1189   : > { %3447 = vmatpush3.bf16.msra.mxu0 %v3535_v30  ;;  %2656 = vmatprep.subr.bf16.mxu1 %v3549_v5  ;;  %v3561_v30 = vld [vmem:[%s4324_s18 + $0x10] sm:$0xff]  }
0x118a   : > { %3448 = vmatprep.subr.bf16.mxu0 %v3633_v28 }
0x118c   : > { %2657 = vmatpush1.bf16.msra.mxu1 %v3547_v6 }
0x118d   : > { %3449 = vmatpush3.bf16.msra.mxu0 %v3536_v31  ;;  %3247 = vmatprep.subr.bf16.mxu1 %v3550_v17  ;;  %v3562_v31 = vld [vmem:[%s4324_s18 + $0x48] sm:$0xff]   ;;  %v2886_v17 = vld [vmem:[%s4327_s21] sm:$0x1] }
0x118e   : > { %3450 = vmatprep.subr.bf16.mxu0 %v3633_v28 }
0x1191   : > { %3451 = vmatpush3.bf16.msra.mxu0 %v3537_v32  ;;  %v3563_v32 = vld [vmem:[%s4324_s18 + $0x8] sm:$0xff]  }
0x1192   : > { %3456 = vmatprep.subr.bf16.mxu0 %v3633_v28 }
0x123f   : > { %v2417_v34 = vpop.f32.mrf.mxu1 }
0x1240   : > { %v2418_v35 = vadd.f32 %v3110_v33, %v2417_v34  ;;  %v3564_v33 = vld [vmem:[%s4324_s18 + $0x40] sm:$0xff]  }
0x1241   : > { %v3434_v36 = vpop.f32.mrf.mxu1  ;;  %v3565_v34 = vld [vmem:[%s4324_s18] sm:$0xff]  }
0x1242   : > { %v2423_v37 = vmul.f32 %v2418_v35, %v2418_v35 }
0x1243   : > { %v2420_v39 = vpop.f32.mrf.mxu1 }
0x1244   : > { %v2424_v40 = vmul.f32 %v2423_v37, %v2418_v35 }
0x1245   : > { %v3435_v41 = vpop.f32.mrf.mxu1 }
0x1246   : > { %v2425_v42 = vmul.f32 0.044715, %v2424_v40 }
0x1248   : > { %v2426_v43 = vadd.f32 %v2425_v42, %v2418_v35 }
0x124a   : > { %v2427_v45 = vmul.f32 0.7978846, %v2426_v43 }
0x124c   : > { %3610 = vtanh.f32 %v2427_v45 }
0x1259   : > { %v3611_v46 = vpop.eup %3610 }
0x125a   : > { %v2429_v47 = vadd.f32 1.0, %v3611_v46 }
0x125c   : > { %v2430_v48 = vmul.f32 0.5, %v2429_v47 }
0x125e   : > { %v2431_v49 = vmul.f32 %v2430_v48, %v2418_v35  ;;  %v2587_v35 = vld [vmem:[%s4323_s17] sm:$0x3] }
0x125f   : > { %v2632_v36 = vrot.slane %v2587_v35, %v3811_v29  ;;  %v2636_v37 = vrot.slane %v2587_v35, %v3828_v38 }
0x1260   : > { %v2449_v24 = vpack.c.bf16 %v2431_v49, %v2431_v49 }
0x1262   : > { %3453 = vmatmul.mubr.bf16.vlgmr.msra.gmra.mxu0 %v2449_v24 }
0x1263   : > { %3460 = vmatprep.mubr.msk.bf16.mxu0 %vm3634_vm1, %v3633_v28  ;;  %3457 = vmatpush3.bf16.msra.mxu0 %v3566_v63 }
0x1264   : > { %3458 = vmatprep.subr.bf16.mxu0 %v3633_v28 }
0x1267   : > { %3459 = vmatpush3.bf16.msra.mxu0 %v3567_v0 }
0x1322   : > { %v2540_v51 = vpop.f32.mrf.mxu0 }
0x1323   : > { %v2541_v52 = vadd.f32 %v3133_v50, %v2540_v51 }
0x1324   : > { %v3454_v53 = vpop.f32.mrf.mxu0 }
0x1325   : > { %v2546_v44 = vadd.f32 %v2541_v52, %v2337_v21  ;;  %v3554_v21 = vld [vmem:[%s4324_s18 + $0x68] sm:$0xff]  }
0x1326   : > { %v2543_v55 = vpop.f32.mrf.mxu0 }
0x1327   : > { %v2551_v57 = vsel %vm696_vm0, %v2546_v44, 0.0 }
0x1328   : > { %2552 = vadd.xlane.f32.xlu0 %v2551_v57  ;;  %v3455_v58 = vpop.f32.mrf.mxu0 }
0x13b1   : > { %v2553_v59 = vpop.xlane.xlu0 %2552 }
0x13b2   : > { %v2554_v60 = vmul.f32 0.015625, %v2553_v59 }
0x13b4   : > { %v2555_v61 = vsub.f32 %v2546_v44, %v2554_v60 }
0x13b6   : > { %v2556_v54 = vmul.f32 %v2555_v61, %v2555_v61 }
0x13b8   : > { %v2557_v62 = vsel %vm696_vm0, %v2556_v54, 0.0 }
0x13b9   : > { %2558 = vadd.xlane.f32.xlu1 %v2557_v62 }
0x1442   : > { %v2559_v7 = vpop.xlane.xlu1 %2558 }
0x1443   : > { %v2560_v8 = vmul.f32 0.015625, %v2559_v7 }
0x1445   : > { %v2561_v10 = vadd.f32 1e-12, %v2560_v8 }
0x1447   : > { %3612 = vrsqrt.f32 %v2561_v10 }
0x1454   : > { %v3613_v56 = vpop.eup %3612 }
0x1455   : > { %v2563_v13 = vmul.f32 %v3613_v56, %v2555_v61 }
0x1457   : > { %v2570_v15 = vmul.f32 %v3144_v12, %v2563_v13 }
0x1459   : > { %v2577_v16 = vadd.f32 %v3145_v14, %v2570_v15 }
0x145b   : > { %v2586_v9 = vpack.c.bf16 %v2577_v16, %v2577_v16 }
0x145d   : > { %3154 = vmatmul.mubr.msk.bf16.vlgmr.msra.gmra.mxu1 %vm696_vm0, %v2586_v9 }
0x145e   : > { %3248 = vmatpush3.bf16.msra.mxu1 %v3551_v18 }
0x145f   : > { %3249 = vmatprep.subr.bf16.mxu1 %v3552_v19 }
0x1462   : > { %3250 = vmatpush3.bf16.msra.mxu1 %v3553_v20 }
0x1463   : > { %3251 = vmatprep.subr.bf16.mxu1 %v3554_v21 }
0x1466   : > { %3252 = vmatpush3.bf16.msra.mxu1 %v3555_v22 }
0x1467   : > { %3253 = vmatprep.subr.bf16.mxu1 %v3556_v23 }
0x146a   : > { %3254 = vmatpush3.bf16.msra.mxu1 %v3557_v25 }
0x146b   : > { %3255 = vmatprep.subr.bf16.mxu1 %v3558_v26 }
0x146e   : > { %3256 = vmatpush3.bf16.msra.mxu1 %v3559_v11 }
0x146f   : > { %3257 = vmatprep.subr.bf16.mxu1 %v3560_v27 }
0x1472   : > { %3258 = vmatpush3.bf16.msra.mxu1 %v3561_v30 }
0x1473   : > { %3259 = vmatprep.subr.bf16.mxu1 %v3562_v31 }
0x1476   : > { %3260 = vmatpush3.bf16.msra.mxu1 %v3563_v32 }
0x1477   : > { %3261 = vmatprep.subr.bf16.mxu1 %v3564_v33 }
0x147a   : > { %3262 = vmatpush3.bf16.msra.mxu1 %v3565_v34 }
0x151d   : > { %v2676_v39 = vpop.f32.mrf.mxu1 }
0x151e   : > { %v2677_v40 = vadd.f32 %v2676_v39, %v2632_v36 }
0x151f   : > { %v2678_v41 = vpop.f32.mrf.mxu1 }
0x1520   : > { %v2683_v42 = vmul.f32 %v2677_v40, %v2677_v40  ;;  %v2679_v43 = vadd.f32 %v2678_v41, %v2636_v37 }
0x1521   : > { %v2680_v45 = vpop.f32.mrf.mxu1 }
0x1522   : > { %v2685_v46 = vmul.f32 %v2683_v42, %v2677_v40  ;;  %v2684_v47 = vmul.f32 %v2679_v43, %v2679_v43 }
0x1523   : > { %v2681_v48 = vpop.f32.mrf.mxu1 }
0x1524   : > { %v2687_v49 = vmul.f32 0.044715, %v2685_v46  ;;  %v2686_v24 = vmul.f32 %v2684_v47, %v2679_v43 }
0x1526   : > { %v2689_v50 = vadd.f32 %v2687_v49, %v2677_v40  ;;  %v2688_v51 = vmul.f32 0.044715, %v2686_v24 }
0x1528   : > { %v2691_v52 = vmul.f32 0.7978846, %v2689_v50  ;;  %v2690_v53 = vadd.f32 %v2688_v51, %v2679_v43 }
0x152a   : > { %3614 = vtanh.f32 %v2691_v52  ;;  %v2692_v44 = vmul.f32 0.7978846, %v2690_v53 }
0x152c   : > { %3616 = vtanh.f32 %v2692_v44 }
0x1537   : > { %v3615_v29 = vpop.eup %3614 }
0x1538   : > { %v2695_v38 = vadd.f32 1.0, %v3615_v29 }
0x1539   : > { %v3617_v55 = vpop.eup %3616 }
0x153a   : > { %v2696_v57 = vadd.f32 1.0, %v3617_v55  ;;  %v2697_v58 = vmul.f32 0.5, %v2695_v38 }
0x153c   : > { %v2698_v59 = vmul.f32 0.5, %v2696_v57  ;;  %v2699_v60 = vmul.f32 %v2697_v58, %v2677_v40 }
0x153e   : > { %v2700_v61 = vmul.f32 %v2698_v59, %v2679_v43  ;;  %v2733_v62 = vpack.c.bf16 %v2699_v60, %v2699_v60 }
0x1540   : > { %v2734_v54 = vpack.c.bf16 %v2700_v61, %v2700_v61 }
0x1542   : > { %2864 = vmatprep.mubr.bf16.mxu1 %v2734_v54 }
0x1543   : > { %2865 = vmatmul.mubr.bf16.vlgmr.msra.gmra.mxu1 %v2733_v62 }
0x1603   : > { %v3263_v1 = vpop.f32.mrf.mxu1 }
0x1605   : > { %v3264_v3 = vpop.f32.mrf.mxu1 }
0x1606   : > { %v3265_v4 = vadd.f32 %v3264_v3, %v3263_v1 }
0x1607   : > { %v3266_v5 = vpop.f32.mrf.mxu1 }
0x1608   : > { %v2867_v6 = vadd.f32 %v3265_v4, %v2735_v2 }
0x1609   : > { %v3267_v7 = vpop.f32.mrf.mxu1 }
0x160a   : > { %v2872_v8 = vmul.f32 %v2867_v6, %v2867_v6 }
0x160c   : > { %v2873_v10 = vmul.f32 %v2872_v8, %v2867_v6 }
0x160e   : > { %v2874_v56 = vmul.f32 0.044715, %v2873_v10 }
0x1610   : > { %v2875_v12 = vadd.f32 %v2874_v56, %v2867_v6 }
0x1612   : > { %v2876_v28 = vmul.f32 0.7978846, %v2875_v12 }
0x1614   : > { %3618 = vtanh.f32 %v2876_v28 }
0x1621   : > { %v3619_v13 = vpop.eup %3618 }
0x1622   : > { %v2878_v14 = vadd.f32 1.0, %v3619_v13 }
0x1624   : > { %v2879_v15 = vmul.f32 0.5, %v2878_v14 }
0x1626   : > { %v2880_v16 = vmul.f32 %v2879_v15, %v2867_v6 }
0x1628   : > { %v2885_v9 = vpack.c.bf16 %v2880_v16, %v2880_v16 }
0x162a   : > { %3461 = vmatmul.mubr.msk.bf16.vlgmr.msra.gmra.mxu0 %vm1300_vm5, %v2885_v9 }
0x16ea   : > { %v2936_v18 = vpop.f32.mrf.mxu0 }
0x16eb   : > { %v2937_v19 = vadd.f32 %v2936_v18, %v2886_v17 }
0x16ec   : > { %v3462_v20 = vpop.f32.mrf.mxu0 }
0x16ed   : > { %v3174_v21 = vmul.f32 -1.442695, %v2937_v19 }
0x16ee   : > { %v2939_v22 = vpop.f32.mrf.mxu0 }
0x16ef   : > { %3620 = vpow2.f32 %v3174_v21 }
0x16f0   : > { %v3463_v23 = vpop.f32.mrf.mxu0 }
0x16fc   : > { %v3621_v25 = vpop.eup %3620 }
0x16fd   : > { %v2945_v26 = vadd.f32 1.0, %v3621_v25 }
0x16ff   : > { %3622 = vrcp.f32 %v2945_v26 }
0x170c   : > { %v3623_v11 = vpop.eup %3622 }
0x170d   : > { %2948 = vst [vmem:[%s690_s6] sm:$0x1] %v3623_v11 }
0x170e PF: > { %s32_s3 = sadd.s32 1, %s3630_s3  }
0x170f   : > { %p29_p4 = scmp.ge.s32.totalorder %s32_s3, 4  }
0x1711   :  { %31 = sbr.rel (!%p29_p4) target bundleno = 8 (0x8), region = 153 }

</bundles_post_ra>
